<compile_context>
chip_gen: v6e
topology: v6e:2x2x1
jax: 0.10.0
libtpu: 0.0.40
codegen_flags: <defaults>
</compile_context>

<pallas_src>
import functools

import numpy as np
import jax
import jax.numpy as jnp
from jax import lax
from jax.experimental import pallas as pl
from jax.experimental.pallas import tpu as pltpu


# --------------------------------------------------------------------------
# Constant structure matrices (pure numpy -> baked-in constants)
# --------------------------------------------------------------------------
def _shift_matrices(H, KH=3):
    """Sh[kh] @ x  ==  x shifted so row h reads input row h+kh-pad (zero OOB)."""
    pad = (KH - 1) // 2
    sh = np.zeros((KH, H, H), np.float32)
    for kh in range(KH):
        for h in range(H):
            hp = h + kh - pad
            if 0 <= hp < H:
                sh[kh, h, hp] = 1.0
    return jnp.asarray(sh)


def _band_mask(W, KW=3):
    """m[kw, iw, w] = 1  iff  iw == w + kw - pad  (valid W index)."""
    pad = (KW - 1) // 2
    m = np.zeros((KW, W, W), np.float32)
    for kw in range(KW):
        for w in range(W):
            iw = w + kw - pad
            if 0 <= iw < W:
                m[kw, iw, w] = 1.0
    return jnp.asarray(m)


def _band_matrices(w_hwio, W):
    """Conv weights (KH,KW,Cin,Cout) -> banded matmul weights (KH, W*Cin, W*Cout)."""
    KH, KW, Cin, Cout = w_hwio.shape
    m = _band_mask(W, KW)
    # B[kh, iw, ci, w, co] = sum_kw m[kw, iw, w] * w[kh, kw, ci, co]
    B = jnp.einsum("kiw,hkco->hicwo", m, w_hwio)
    return B.reshape(KH, W * Cin, W * Cout)


def _pool_matrices(H, W, C):
    """AvgPool2x2 in rows layout:  pooled = 0.25 * Ph @ res @ Pw."""
    H2, W2 = H // 2, W // 2
    ph = np.repeat(np.eye(H2, dtype=np.float32), 2, axis=1)          # (H2, H)
    s = np.repeat(np.eye(W2, dtype=np.float32), 2, axis=0)           # (W, W2)
    pw = np.kron(s, np.eye(C, dtype=np.float32))                     # (W*C, W2*C)
    return jnp.asarray(ph), jnp.asarray(pw)


def _shuffle_matrices(H, W, C, r=2):
    """PixelShuffle(2) in rows layout:  ps = sum_i E[i] @ (u @ Q[i]).

    Channel ordering matches torch.nn.PixelShuffle: oc = c*r*r + i*r + j.
    """
    H2, W2 = H // r, W // r
    C4 = C * r * r
    Q = np.zeros((r, W2 * C4, W * C), np.float32)
    for i in range(r):
        for w2 in range(W2):
            for j in range(r):
                for c in range(C):
                    Q[i, w2 * C4 + c * r * r + i * r + j, (r * w2 + j) * C + c] = 1.0
    E = np.zeros((r, H, H2), np.float32)
    for i in range(r):
        for h2 in range(H2):
            E[i, r * h2 + i, h2] = 1.0
    return jnp.asarray(Q), jnp.asarray(E)


# --------------------------------------------------------------------------
# Fused HFBlock kernel (one batch element per grid step)
# --------------------------------------------------------------------------
def _hf_block_kernel(x_ref, sh1_ref, b1_ref, bias1_ref, b2_ref, bias2_ref,
                     ph_ref, pw_ref, sh2_ref, b3_ref, bias3_ref,
                     q_ref, e_ref, o_ref, *, res_scale):
    dot = functools.partial(jnp.dot, preferred_element_type=jnp.float32)

    def conv_rows(inp, sh_ref_, bmat_ref_, bias_ref_):
        # inp: (Hc, Wc*Cin); 3x3 same-conv as 3 (shift @ inp @ band) matmuls.
        acc = dot(dot(sh_ref_[0], inp), bmat_ref_[0])
        acc = acc + dot(dot(sh_ref_[1], inp), bmat_ref_[1])
        acc = acc + dot(dot(sh_ref_[2], inp), bmat_ref_[2])
        return acc + bias_ref_[...]                       # (1, Wc*Cout) bcast

    x = x_ref[0]                                          # (H, W*C)   lane-dense
    h1 = jnp.maximum(conv_rows(x, sh1_ref, b1_ref, bias1_ref), 0.0)
    res = conv_rows(h1, sh1_ref, b2_ref, bias2_ref)       # body(x)
    if res_scale != 1.0:                                  # res_scale is static
        res = res * jnp.float32(res_scale)

    # AvgPool2d(2): (H, W*C) -> (H/2, W/2*C)  as two matmuls.
    pooled = 0.25 * dot(dot(ph_ref[...], res), pw_ref[...])

    # Upsample conv: (H/2, W/2*C) -> (H/2, W/2*4C)
    u = conv_rows(pooled, sh2_ref, b3_ref, bias3_ref)

    # PixelShuffle(2) + subtract, fused (no 6-D transpose, no extra kernel).
    ps = dot(e_ref[0], dot(u, q_ref[0])) + dot(e_ref[1], dot(u, q_ref[1]))
    o_ref[0] = (res - ps).astype(o_ref.dtype)


def hf_block_forward(x_nchw, params, *, res_scale=1.0):
    N, C, H, W = x_nchw.shape
    H2, W2 = H // 2, W // 2
    C4 = 4 * C

    # NCHW -> lane-dense rows layout (N, H, W*C); transpose+reshape are the only
    # XLA glue on the activation path.
    x_rows = jnp.transpose(x_nchw, (0, 2, 3, 1)).reshape(N, H, W * C)

    # Structure constants (numpy, baked in) + weight-derived band matrices.
    sh1 = _shift_matrices(H)                      # (3, H, H)
    sh2 = _shift_matrices(H2)                     # (3, H/2, H/2)
    B1 = _band_matrices(params["w1"], W)          # (3, W*C, W*C)
    B2 = _band_matrices(params["w2"], W)          # (3, W*C, W*C)
    B3 = _band_matrices(params["w3"], W2)         # (3, W/2*C, W/2*4C)
    bias1 = jnp.tile(params["b1"], W).reshape(1, W * C)
    bias2 = jnp.tile(params["b2"], W).reshape(1, W * C)
    bias3 = jnp.tile(params["b3"], W2).reshape(1, W2 * C4)
    ph, pw = _pool_matrices(H, W, C)              # (H/2, H), (W*C, W/2*C)
    Q, E = _shuffle_matrices(H, W, C)             # (2, W/2*4C, W*C), (2, H, H/2)

    def const_spec(a):
        nd = a.ndim
        return pl.BlockSpec(a.shape, lambda n, _nd=nd: (0,) * _nd)

    kernel = functools.partial(_hf_block_kernel, res_scale=float(res_scale))
    out_rows = pl.pallas_call(
        kernel,
        out_shape=jax.ShapeDtypeStruct((N, H, W * C), jnp.float32),
        grid=(N,),
        in_specs=[
            pl.BlockSpec((1, H, W * C), lambda n: (n, 0, 0)),
            const_spec(sh1), const_spec(B1), const_spec(bias1),
            const_spec(B2), const_spec(bias2),
            const_spec(ph), const_spec(pw),
            const_spec(sh2), const_spec(B3), const_spec(bias3),
            const_spec(Q), const_spec(E),
        ],
        out_specs=pl.BlockSpec((1, H, W * C), lambda n: (n, 0, 0)),
        compiler_params=pltpu.CompilerParams(
            dimension_semantics=("parallel",)),   # batch -> v7x 2 TCs
    )(x_rows, sh1, B1, bias1, B2, bias2, ph, pw, sh2, B3, bias3, Q, E)

    out = out_rows.reshape(N, H, W, C)
    return jnp.transpose(out, (0, 3, 1, 2))       # NHWC -> NCHW


# --------------------------------------------------------------------------
# Pure-JAX reference
# --------------------------------------------------------------------------
def _pixel_shuffle_nhwc(x, r=2):
    N, Hs, Ws, Crr = x.shape
    C = Crr // (r * r)
    x = x.reshape(N, Hs, Ws, C, r, r)
    x = x.transpose(0, 1, 4, 2, 5, 3)
    return x.reshape(N, Hs * r, Ws * r, C)


def hf_block_reference(x_nchw, params, *, res_scale=1.0):
    x = jnp.transpose(x_nchw, (0, 2, 3, 1))
    dn = ("NHWC", "HWIO", "NHWC")

    def conv(t, w, b):
        return lax.conv_general_dilated(
            t, w, (1, 1), "SAME", dimension_numbers=dn,
            precision=lax.Precision.HIGHEST) + b

    h = jax.nn.relu(conv(x, params["w1"], params["b1"]))
    res = conv(h, params["w2"], params["b2"]) * res_scale
    N, H, W, C = res.shape
    res_h = res.reshape(N, H // 2, 2, W // 2, 2, C).mean(axis=(2, 4))
    up = _pixel_shuffle_nhwc(conv(res_h, params["w3"], params["b3"]), 2)
    return jnp.transpose(res - up, (0, 3, 1, 2))


if __name__ == "__main__":
    # Small shapes consistent with the module: n_feats=4, kernel_size=3.
    N, C, H, W = 2, 4, 16, 16
    ksize = 3
    res_scale = 1.0

    key = jax.random.PRNGKey(0)
    k = jax.random.split(key, 7)
    x = jax.random.normal(k[0], (N, C, H, W), jnp.float32)
    params = {
        # body conv1: n_feats -> n_feats
        "w1": 0.1 * jax.random.normal(k[1], (ksize, ksize, C, C), jnp.float32),
        "b1": 0.1 * jax.random.normal(k[2], (C,), jnp.float32),
        # body conv2: n_feats -> n_feats
        "w2": 0.1 * jax.random.normal(k[3], (ksize, ksize, C, C), jnp.float32),
        "b2": 0.1 * jax.random.normal(k[4], (C,), jnp.float32),
        # upsample conv: n_feats -> 4*n_feats, kernel 3 (fixed in module)
        "w3": 0.1 * jax.random.normal(k[5], (3, 3, C, 4 * C), jnp.float32),
        "b3": 0.1 * jax.random.normal(k[6], (4 * C,), jnp.float32),
    }

    fwd = jax.jit(functools.partial(hf_block_forward, res_scale=res_scale))
    out = jax.block_until_ready(fwd(x, params))

    ref = hf_block_reference(x, params, res_scale=res_scale)
    assert out.shape == (N, C, H, W), out.shape
    max_err = float(jnp.max(jnp.abs(out - ref)))
    assert jnp.allclose(out, ref, rtol=2e-2, atol=2e-2), f"max_err={max_err}"

    print("KERNEL_OK")
</pallas_src>

<mosaic_0001>
module attributes {stable_mosaic.version = 11 : i64} {
  func.func @_hf_block_kernel(%arg0: i32, %arg1: memref<1x16x64xf32, #tpu.memory_space<vmem>>, %arg2: memref<3x16x16xf32, #tpu.memory_space<vmem>>, %arg3: memref<3x64x64xf32, #tpu.memory_space<vmem>>, %arg4: memref<1x64xf32, #tpu.memory_space<vmem>>, %arg5: memref<3x64x64xf32, #tpu.memory_space<vmem>>, %arg6: memref<1x64xf32, #tpu.memory_space<vmem>>, %arg7: memref<8x16xf32, #tpu.memory_space<vmem>>, %arg8: memref<64x32xf32, #tpu.memory_space<vmem>>, %arg9: memref<3x8x8xf32, #tpu.memory_space<vmem>>, %arg10: memref<3x32x128xf32, #tpu.memory_space<vmem>>, %arg11: memref<1x128xf32, #tpu.memory_space<vmem>>, %arg12: memref<2x128x64xf32, #tpu.memory_space<vmem>>, %arg13: memref<2x16x8xf32, #tpu.memory_space<vmem>>, %arg14: memref<1x16x64xf32, #tpu.memory_space<vmem>>) attributes {dimension_semantics = [#tpu.dimension_semantics<parallel>], iteration_bounds = array<i64: 2>, scalar_prefetch = 0 : i64, scratch_operands = 0 : i64, tpu.core_type = #tpu.core_type<tc>, window_params = [{transform_indices = @transform_0, window_bounds = array<i64: 1, 16, 64>}, {pipeline_mode = #tpu.pipeline_mode<synchronous>, transform_indices = @transform_1, window_bounds = array<i64: 3, 16, 16>}, {pipeline_mode = #tpu.pipeline_mode<synchronous>, transform_indices = @transform_2, window_bounds = array<i64: 3, 64, 64>}, {pipeline_mode = #tpu.pipeline_mode<synchronous>, transform_indices = @transform_3, window_bounds = array<i64: 1, 64>}, {pipeline_mode = #tpu.pipeline_mode<synchronous>, transform_indices = @transform_4, window_bounds = array<i64: 3, 64, 64>}, {pipeline_mode = #tpu.pipeline_mode<synchronous>, transform_indices = @transform_5, window_bounds = array<i64: 1, 64>}, {pipeline_mode = #tpu.pipeline_mode<synchronous>, transform_indices = @transform_6, window_bounds = array<i64: 8, 16>}, {pipeline_mode = #tpu.pipeline_mode<synchronous>, transform_indices = @transform_7, window_bounds = array<i64: 64, 32>}, {pipeline_mode = #tpu.pipeline_mode<synchronous>, transform_indices = @transform_8, window_bounds = array<i64: 3, 8, 8>}, {pipeline_mode = #tpu.pipeline_mode<synchronous>, transform_indices = @transform_9, window_bounds = array<i64: 3, 32, 128>}, {pipeline_mode = #tpu.pipeline_mode<synchronous>, transform_indices = @transform_10, window_bounds = array<i64: 1, 128>}, {pipeline_mode = #tpu.pipeline_mode<synchronous>, transform_indices = @transform_11, window_bounds = array<i64: 2, 128, 64>}, {pipeline_mode = #tpu.pipeline_mode<synchronous>, transform_indices = @transform_12, window_bounds = array<i64: 2, 16, 8>}, {transform_indices = @transform_13, window_bounds = array<i64: 1, 16, 64>}]} {
    %c0 = arith.constant 0 : index
    %c0_0 = arith.constant 0 : index
    %c0_1 = arith.constant 0 : index
    %0 = vector.load %arg1[%c0, %c0_0, %c0_1] : memref<1x16x64xf32, #tpu.memory_space<vmem>>, vector<1x16x64xf32>
    %1 = vector.shape_cast %0 : vector<1x16x64xf32> to vector<16x64xf32>
    %c0_2 = arith.constant 0 : index
    %c0_3 = arith.constant 0 : index
    %c0_4 = arith.constant 0 : index
    %2 = vector.load %arg2[%c0_2, %c0_3, %c0_4] : memref<3x16x16xf32, #tpu.memory_space<vmem>>, vector<1x16x16xf32>
    %3 = vector.shape_cast %2 : vector<1x16x16xf32> to vector<16x16xf32>
    %cst = arith.constant dense<0.000000e+00> : vector<16x64xf32>
    %4 = tpu.matmul %3, %1, %cst {dimension_numbers = #tpu.dot_dimension_numbers<[1], [0], [0], [1], [0, 0, 1, 1], [], []>} : vector<16x16xf32>, vector<16x64xf32>, vector<16x64xf32> -> vector<16x64xf32>
    %c0_5 = arith.constant 0 : index
    %c0_6 = arith.constant 0 : index
    %c0_7 = arith.constant 0 : index
    %5 = vector.load %arg3[%c0_5, %c0_6, %c0_7] : memref<3x64x64xf32, #tpu.memory_space<vmem>>, vector<1x64x64xf32>
    %6 = vector.shape_cast %5 : vector<1x64x64xf32> to vector<64x64xf32>
    %cst_8 = arith.constant dense<0.000000e+00> : vector<16x64xf32>
    %7 = tpu.matmul %4, %6, %cst_8 {dimension_numbers = #tpu.dot_dimension_numbers<[1], [0], [0], [1], [0, 0, 1, 1], [], []>} : vector<16x64xf32>, vector<64x64xf32>, vector<16x64xf32> -> vector<16x64xf32>
    %c1 = arith.constant 1 : index
    %c0_9 = arith.constant 0 : index
    %c0_10 = arith.constant 0 : index
    %8 = vector.load %arg2[%c1, %c0_9, %c0_10] : memref<3x16x16xf32, #tpu.memory_space<vmem>>, vector<1x16x16xf32>
    %9 = vector.shape_cast %8 : vector<1x16x16xf32> to vector<16x16xf32>
    %cst_11 = arith.constant dense<0.000000e+00> : vector<16x64xf32>
    %10 = tpu.matmul %9, %1, %cst_11 {dimension_numbers = #tpu.dot_dimension_numbers<[1], [0], [0], [1], [0, 0, 1, 1], [], []>} : vector<16x16xf32>, vector<16x64xf32>, vector<16x64xf32> -> vector<16x64xf32>
    %c1_12 = arith.constant 1 : index
    %c0_13 = arith.constant 0 : index
    %c0_14 = arith.constant 0 : index
    %11 = vector.load %arg3[%c1_12, %c0_13, %c0_14] : memref<3x64x64xf32, #tpu.memory_space<vmem>>, vector<1x64x64xf32>
    %12 = vector.shape_cast %11 : vector<1x64x64xf32> to vector<64x64xf32>
    %cst_15 = arith.constant dense<0.000000e+00> : vector<16x64xf32>
    %13 = tpu.matmul %10, %12, %cst_15 {dimension_numbers = #tpu.dot_dimension_numbers<[1], [0], [0], [1], [0, 0, 1, 1], [], []>} : vector<16x64xf32>, vector<64x64xf32>, vector<16x64xf32> -> vector<16x64xf32>
    %14 = arith.addf %7, %13 : vector<16x64xf32>
    %c2 = arith.constant 2 : index
    %c0_16 = arith.constant 0 : index
    %c0_17 = arith.constant 0 : index
    %15 = vector.load %arg2[%c2, %c0_16, %c0_17] : memref<3x16x16xf32, #tpu.memory_space<vmem>>, vector<1x16x16xf32>
    %16 = vector.shape_cast %15 : vector<1x16x16xf32> to vector<16x16xf32>
    %cst_18 = arith.constant dense<0.000000e+00> : vector<16x64xf32>
    %17 = tpu.matmul %16, %1, %cst_18 {dimension_numbers = #tpu.dot_dimension_numbers<[1], [0], [0], [1], [0, 0, 1, 1], [], []>} : vector<16x16xf32>, vector<16x64xf32>, vector<16x64xf32> -> vector<16x64xf32>
    %c2_19 = arith.constant 2 : index
    %c0_20 = arith.constant 0 : index
    %c0_21 = arith.constant 0 : index
    %18 = vector.load %arg3[%c2_19, %c0_20, %c0_21] : memref<3x64x64xf32, #tpu.memory_space<vmem>>, vector<1x64x64xf32>
    %19 = vector.shape_cast %18 : vector<1x64x64xf32> to vector<64x64xf32>
    %cst_22 = arith.constant dense<0.000000e+00> : vector<16x64xf32>
    %20 = tpu.matmul %17, %19, %cst_22 {dimension_numbers = #tpu.dot_dimension_numbers<[1], [0], [0], [1], [0, 0, 1, 1], [], []>} : vector<16x64xf32>, vector<64x64xf32>, vector<16x64xf32> -> vector<16x64xf32>
    %21 = arith.addf %14, %20 : vector<16x64xf32>
    %c0_23 = arith.constant 0 : index
    %c0_24 = arith.constant 0 : index
    %22 = vector.load %arg4[%c0_23, %c0_24] : memref<1x64xf32, #tpu.memory_space<vmem>>, vector<1x64xf32>
    %23 = vector.broadcast %22 : vector<1x64xf32> to vector<16x64xf32>
    %24 = arith.addf %21, %23 : vector<16x64xf32>
    %cst_25 = arith.constant 0.000000e+00 : f32
    %25 = vector.broadcast %cst_25 : f32 to vector<16x64xf32>
    %26 = arith.maximumf %24, %25 : vector<16x64xf32>
    %c0_26 = arith.constant 0 : index
    %c0_27 = arith.constant 0 : index
    %c0_28 = arith.constant 0 : index
    %27 = vector.load %arg2[%c0_26, %c0_27, %c0_28] : memref<3x16x16xf32, #tpu.memory_space<vmem>>, vector<1x16x16xf32>
    %28 = vector.shape_cast %27 : vector<1x16x16xf32> to vector<16x16xf32>
    %cst_29 = arith.constant dense<0.000000e+00> : vector<16x64xf32>
    %29 = tpu.matmul %28, %26, %cst_29 {dimension_numbers = #tpu.dot_dimension_numbers<[1], [0], [0], [1], [0, 0, 1, 1], [], []>} : vector<16x16xf32>, vector<16x64xf32>, vector<16x64xf32> -> vector<16x64xf32>
    %c0_30 = arith.constant 0 : index
    %c0_31 = arith.constant 0 : index
    %c0_32 = arith.constant 0 : index
    %30 = vector.load %arg5[%c0_30, %c0_31, %c0_32] : memref<3x64x64xf32, #tpu.memory_space<vmem>>, vector<1x64x64xf32>
    %31 = vector.shape_cast %30 : vector<1x64x64xf32> to vector<64x64xf32>
    %cst_33 = arith.constant dense<0.000000e+00> : vector<16x64xf32>
    %32 = tpu.matmul %29, %31, %cst_33 {dimension_numbers = #tpu.dot_dimension_numbers<[1], [0], [0], [1], [0, 0, 1, 1], [], []>} : vector<16x64xf32>, vector<64x64xf32>, vector<16x64xf32> -> vector<16x64xf32>
    %c1_34 = arith.constant 1 : index
    %c0_35 = arith.constant 0 : index
    %c0_36 = arith.constant 0 : index
    %33 = vector.load %arg2[%c1_34, %c0_35, %c0_36] : memref<3x16x16xf32, #tpu.memory_space<vmem>>, vector<1x16x16xf32>
    %34 = vector.shape_cast %33 : vector<1x16x16xf32> to vector<16x16xf32>
    %cst_37 = arith.constant dense<0.000000e+00> : vector<16x64xf32>
    %35 = tpu.matmul %34, %26, %cst_37 {dimension_numbers = #tpu.dot_dimension_numbers<[1], [0], [0], [1], [0, 0, 1, 1], [], []>} : vector<16x16xf32>, vector<16x64xf32>, vector<16x64xf32> -> vector<16x64xf32>
    %c1_38 = arith.constant 1 : index
    %c0_39 = arith.constant 0 : index
    %c0_40 = arith.constant 0 : index
    %36 = vector.load %arg5[%c1_38, %c0_39, %c0_40] : memref<3x64x64xf32, #tpu.memory_space<vmem>>, vector<1x64x64xf32>
    %37 = vector.shape_cast %36 : vector<1x64x64xf32> to vector<64x64xf32>
    %cst_41 = arith.constant dense<0.000000e+00> : vector<16x64xf32>
    %38 = tpu.matmul %35, %37, %cst_41 {dimension_numbers = #tpu.dot_dimension_numbers<[1], [0], [0], [1], [0, 0, 1, 1], [], []>} : vector<16x64xf32>, vector<64x64xf32>, vector<16x64xf32> -> vector<16x64xf32>
    %39 = arith.addf %32, %38 : vector<16x64xf32>
    %c2_42 = arith.constant 2 : index
    %c0_43 = arith.constant 0 : index
    %c0_44 = arith.constant 0 : index
    %40 = vector.load %arg2[%c2_42, %c0_43, %c0_44] : memref<3x16x16xf32, #tpu.memory_space<vmem>>, vector<1x16x16xf32>
    %41 = vector.shape_cast %40 : vector<1x16x16xf32> to vector<16x16xf32>
    %cst_45 = arith.constant dense<0.000000e+00> : vector<16x64xf32>
    %42 = tpu.matmul %41, %26, %cst_45 {dimension_numbers = #tpu.dot_dimension_numbers<[1], [0], [0], [1], [0, 0, 1, 1], [], []>} : vector<16x16xf32>, vector<16x64xf32>, vector<16x64xf32> -> vector<16x64xf32>
    %c2_46 = arith.constant 2 : index
    %c0_47 = arith.constant 0 : index
    %c0_48 = arith.constant 0 : index
    %43 = vector.load %arg5[%c2_46, %c0_47, %c0_48] : memref<3x64x64xf32, #tpu.memory_space<vmem>>, vector<1x64x64xf32>
    %44 = vector.shape_cast %43 : vector<1x64x64xf32> to vector<64x64xf32>
    %cst_49 = arith.constant dense<0.000000e+00> : vector<16x64xf32>
    %45 = tpu.matmul %42, %44, %cst_49 {dimension_numbers = #tpu.dot_dimension_numbers<[1], [0], [0], [1], [0, 0, 1, 1], [], []>} : vector<16x64xf32>, vector<64x64xf32>, vector<16x64xf32> -> vector<16x64xf32>
    %46 = arith.addf %39, %45 : vector<16x64xf32>
    %c0_50 = arith.constant 0 : index
    %c0_51 = arith.constant 0 : index
    %47 = vector.load %arg6[%c0_50, %c0_51] : memref<1x64xf32, #tpu.memory_space<vmem>>, vector<1x64xf32>
    %48 = vector.broadcast %47 : vector<1x64xf32> to vector<16x64xf32>
    %49 = arith.addf %46, %48 : vector<16x64xf32>
    %c0_52 = arith.constant 0 : index
    %c0_53 = arith.constant 0 : index
    %50 = vector.load %arg7[%c0_52, %c0_53] : memref<8x16xf32, #tpu.memory_space<vmem>>, vector<8x16xf32>
    %cst_54 = arith.constant dense<0.000000e+00> : vector<8x64xf32>
    %51 = tpu.matmul %50, %49, %cst_54 {dimension_numbers = #tpu.dot_dimension_numbers<[1], [0], [0], [1], [0, 0, 1, 1], [], []>} : vector<8x16xf32>, vector<16x64xf32>, vector<8x64xf32> -> vector<8x64xf32>
    %c0_55 = arith.constant 0 : index
    %c0_56 = arith.constant 0 : index
    %52 = vector.load %arg8[%c0_55, %c0_56] : memref<64x32xf32, #tpu.memory_space<vmem>>, vector<64x32xf32>
    %cst_57 = arith.constant dense<0.000000e+00> : vector<8x32xf32>
    %53 = tpu.matmul %51, %52, %cst_57 {dimension_numbers = #tpu.dot_dimension_numbers<[1], [0], [0], [1], [0, 0, 1, 1], [], []>} : vector<8x64xf32>, vector<64x32xf32>, vector<8x32xf32> -> vector<8x32xf32>
    %cst_58 = arith.constant 2.500000e-01 : f32
    %54 = vector.broadcast %cst_58 : f32 to vector<8x32xf32>
    %55 = arith.mulf %54, %53 : vector<8x32xf32>
    %c0_59 = arith.constant 0 : index
    %c0_60 = arith.constant 0 : index
    %c0_61 = arith.constant 0 : index
    %56 = vector.load %arg9[%c0_59, %c0_60, %c0_61] : memref<3x8x8xf32, #tpu.memory_space<vmem>>, vector<1x8x8xf32>
    %57 = vector.shape_cast %56 : vector<1x8x8xf32> to vector<8x8xf32>
    %cst_62 = arith.constant dense<0.000000e+00> : vector<8x32xf32>
    %58 = tpu.matmul %57, %55, %cst_62 {dimension_numbers = #tpu.dot_dimension_numbers<[1], [0], [0], [1], [0, 0, 1, 1], [], []>} : vector<8x8xf32>, vector<8x32xf32>, vector<8x32xf32> -> vector<8x32xf32>
    %c0_63 = arith.constant 0 : index
    %c0_64 = arith.constant 0 : index
    %c0_65 = arith.constant 0 : index
    %59 = vector.load %arg10[%c0_63, %c0_64, %c0_65] : memref<3x32x128xf32, #tpu.memory_space<vmem>>, vector<1x32x128xf32>
    %60 = vector.shape_cast %59 : vector<1x32x128xf32> to vector<32x128xf32>
    %cst_66 = arith.constant dense<0.000000e+00> : vector<8x128xf32>
    %61 = tpu.matmul %58, %60, %cst_66 {dimension_numbers = #tpu.dot_dimension_numbers<[1], [0], [0], [1], [0, 0, 1, 1], [], []>} : vector<8x32xf32>, vector<32x128xf32>, vector<8x128xf32> -> vector<8x128xf32>
    %c1_67 = arith.constant 1 : index
    %c0_68 = arith.constant 0 : index
    %c0_69 = arith.constant 0 : index
    %62 = vector.load %arg9[%c1_67, %c0_68, %c0_69] : memref<3x8x8xf32, #tpu.memory_space<vmem>>, vector<1x8x8xf32>
    %63 = vector.shape_cast %62 : vector<1x8x8xf32> to vector<8x8xf32>
    %cst_70 = arith.constant dense<0.000000e+00> : vector<8x32xf32>
    %64 = tpu.matmul %63, %55, %cst_70 {dimension_numbers = #tpu.dot_dimension_numbers<[1], [0], [0], [1], [0, 0, 1, 1], [], []>} : vector<8x8xf32>, vector<8x32xf32>, vector<8x32xf32> -> vector<8x32xf32>
    %c1_71 = arith.constant 1 : index
    %c0_72 = arith.constant 0 : index
    %c0_73 = arith.constant 0 : index
    %65 = vector.load %arg10[%c1_71, %c0_72, %c0_73] : memref<3x32x128xf32, #tpu.memory_space<vmem>>, vector<1x32x128xf32>
    %66 = vector.shape_cast %65 : vector<1x32x128xf32> to vector<32x128xf32>
    %cst_74 = arith.constant dense<0.000000e+00> : vector<8x128xf32>
    %67 = tpu.matmul %64, %66, %cst_74 {dimension_numbers = #tpu.dot_dimension_numbers<[1], [0], [0], [1], [0, 0, 1, 1], [], []>} : vector<8x32xf32>, vector<32x128xf32>, vector<8x128xf32> -> vector<8x128xf32>
    %68 = arith.addf %61, %67 : vector<8x128xf32>
    %c2_75 = arith.constant 2 : index
    %c0_76 = arith.constant 0 : index
    %c0_77 = arith.constant 0 : index
    %69 = vector.load %arg9[%c2_75, %c0_76, %c0_77] : memref<3x8x8xf32, #tpu.memory_space<vmem>>, vector<1x8x8xf32>
    %70 = vector.shape_cast %69 : vector<1x8x8xf32> to vector<8x8xf32>
    %cst_78 = arith.constant dense<0.000000e+00> : vector<8x32xf32>
    %71 = tpu.matmul %70, %55, %cst_78 {dimension_numbers = #tpu.dot_dimension_numbers<[1], [0], [0], [1], [0, 0, 1, 1], [], []>} : vector<8x8xf32>, vector<8x32xf32>, vector<8x32xf32> -> vector<8x32xf32>
    %c2_79 = arith.constant 2 : index
    %c0_80 = arith.constant 0 : index
    %c0_81 = arith.constant 0 : index
    %72 = vector.load %arg10[%c2_79, %c0_80, %c0_81] : memref<3x32x128xf32, #tpu.memory_space<vmem>>, vector<1x32x128xf32>
    %73 = vector.shape_cast %72 : vector<1x32x128xf32> to vector<32x128xf32>
    %cst_82 = arith.constant dense<0.000000e+00> : vector<8x128xf32>
    %74 = tpu.matmul %71, %73, %cst_82 {dimension_numbers = #tpu.dot_dimension_numbers<[1], [0], [0], [1], [0, 0, 1, 1], [], []>} : vector<8x32xf32>, vector<32x128xf32>, vector<8x128xf32> -> vector<8x128xf32>
    %75 = arith.addf %68, %74 : vector<8x128xf32>
    %c0_83 = arith.constant 0 : index
    %c0_84 = arith.constant 0 : index
    %76 = vector.load %arg11[%c0_83, %c0_84] : memref<1x128xf32, #tpu.memory_space<vmem>>, vector<1x128xf32>
    %77 = vector.broadcast %76 : vector<1x128xf32> to vector<8x128xf32>
    %78 = arith.addf %75, %77 : vector<8x128xf32>
    %c0_85 = arith.constant 0 : index
    %c0_86 = arith.constant 0 : index
    %c0_87 = arith.constant 0 : index
    %79 = vector.load %arg13[%c0_85, %c0_86, %c0_87] : memref<2x16x8xf32, #tpu.memory_space<vmem>>, vector<1x16x8xf32>
    %80 = vector.shape_cast %79 : vector<1x16x8xf32> to vector<16x8xf32>
    %c0_88 = arith.constant 0 : index
    %c0_89 = arith.constant 0 : index
    %c0_90 = arith.constant 0 : index
    %81 = vector.load %arg12[%c0_88, %c0_89, %c0_90] : memref<2x128x64xf32, #tpu.memory_space<vmem>>, vector<1x128x64xf32>
    %82 = vector.shape_cast %81 : vector<1x128x64xf32> to vector<128x64xf32>
    %cst_91 = arith.constant dense<0.000000e+00> : vector<8x64xf32>
    %83 = tpu.matmul %78, %82, %cst_91 {dimension_numbers = #tpu.dot_dimension_numbers<[1], [0], [0], [1], [0, 0, 1, 1], [], []>} : vector<8x128xf32>, vector<128x64xf32>, vector<8x64xf32> -> vector<8x64xf32>
    %cst_92 = arith.constant dense<0.000000e+00> : vector<16x64xf32>
    %84 = tpu.matmul %80, %83, %cst_92 {dimension_numbers = #tpu.dot_dimension_numbers<[1], [0], [0], [1], [0, 0, 1, 1], [], []>} : vector<16x8xf32>, vector<8x64xf32>, vector<16x64xf32> -> vector<16x64xf32>
    %c1_93 = arith.constant 1 : index
    %c0_94 = arith.constant 0 : index
    %c0_95 = arith.constant 0 : index
    %85 = vector.load %arg13[%c1_93, %c0_94, %c0_95] : memref<2x16x8xf32, #tpu.memory_space<vmem>>, vector<1x16x8xf32>
    %86 = vector.shape_cast %85 : vector<1x16x8xf32> to vector<16x8xf32>
    %c1_96 = arith.constant 1 : index
    %c0_97 = arith.constant 0 : index
    %c0_98 = arith.constant 0 : index
    %87 = vector.load %arg12[%c1_96, %c0_97, %c0_98] : memref<2x128x64xf32, #tpu.memory_space<vmem>>, vector<1x128x64xf32>
    %88 = vector.shape_cast %87 : vector<1x128x64xf32> to vector<128x64xf32>
    %cst_99 = arith.constant dense<0.000000e+00> : vector<8x64xf32>
    %89 = tpu.matmul %78, %88, %cst_99 {dimension_numbers = #tpu.dot_dimension_numbers<[1], [0], [0], [1], [0, 0, 1, 1], [], []>} : vector<8x128xf32>, vector<128x64xf32>, vector<8x64xf32> -> vector<8x64xf32>
    %cst_100 = arith.constant dense<0.000000e+00> : vector<16x64xf32>
    %90 = tpu.matmul %86, %89, %cst_100 {dimension_numbers = #tpu.dot_dimension_numbers<[1], [0], [0], [1], [0, 0, 1, 1], [], []>} : vector<16x8xf32>, vector<8x64xf32>, vector<16x64xf32> -> vector<16x64xf32>
    %91 = arith.addf %84, %90 : vector<16x64xf32>
    %92 = arith.subf %49, %91 : vector<16x64xf32>
    %c0_101 = arith.constant 0 : index
    %c0_102 = arith.constant 0 : index
    %c0_103 = arith.constant 0 : index
    %93 = vector.load %arg14[%c0_101, %c0_102, %c0_103] : memref<1x16x64xf32, #tpu.memory_space<vmem>>, vector<1x16x64xf32>
    %94 = vector.shape_cast %93 : vector<1x16x64xf32> to vector<16x64xf32>
    %95 = vector.shape_cast %92 : vector<16x64xf32> to vector<1x16x64xf32>
    tpu.vector_store %arg14[%c0_101, %c0_102, %c0_103], %95 {strides = array<i32>} : memref<1x16x64xf32, #tpu.memory_space<vmem>>, vector<1x16x64xf32>,
    return
  }
  func.func @transform_0(%arg0: i32) -> (i32, i32, i32) {
    %c0_i32 = arith.constant 0 : i32
    %c0_i32_0 = arith.constant 0 : i32
    %c0_i32_1 = arith.constant 0 : i32
    return %arg0, %c0_i32, %c0_i32_0 : i32, i32, i32
  }
  func.func @transform_1(%arg0: i32) -> (i32, i32, i32) {
    %c0_i32 = arith.constant 0 : i32
    %c0_i32_0 = arith.constant 0 : i32
    %c0_i32_1 = arith.constant 0 : i32
    %c0_i32_2 = arith.constant 0 : i32
    return %c0_i32, %c0_i32_0, %c0_i32_1 : i32, i32, i32
  }
  func.func @transform_2(%arg0: i32) -> (i32, i32, i32) {
    %c0_i32 = arith.constant 0 : i32
    %c0_i32_0 = arith.constant 0 : i32
    %c0_i32_1 = arith.constant 0 : i32
    %c0_i32_2 = arith.constant 0 : i32
    return %c0_i32, %c0_i32_0, %c0_i32_1 : i32, i32, i32
  }
  func.func @transform_3(%arg0: i32) -> (i32, i32) {
    %c0_i32 = arith.constant 0 : i32
    %c0_i32_0 = arith.constant 0 : i32
    %c0_i32_1 = arith.constant 0 : i32
    return %c0_i32, %c0_i32_0 : i32, i32
  }
  func.func @transform_4(%arg0: i32) -> (i32, i32, i32) {
    %c0_i32 = arith.constant 0 : i32
    %c0_i32_0 = arith.constant 0 : i32
    %c0_i32_1 = arith.constant 0 : i32
    %c0_i32_2 = arith.constant 0 : i32
    return %c0_i32, %c0_i32_0, %c0_i32_1 : i32, i32, i32
  }
  func.func @transform_5(%arg0: i32) -> (i32, i32) {
    %c0_i32 = arith.constant 0 : i32
    %c0_i32_0 = arith.constant 0 : i32
    %c0_i32_1 = arith.constant 0 : i32
    return %c0_i32, %c0_i32_0 : i32, i32
  }
  func.func @transform_6(%arg0: i32) -> (i32, i32) {
    %c0_i32 = arith.constant 0 : i32
    %c0_i32_0 = arith.constant 0 : i32
    %c0_i32_1 = arith.constant 0 : i32
    return %c0_i32, %c0_i32_0 : i32, i32
  }
  func.func @transform_7(%arg0: i32) -> (i32, i32) {
    %c0_i32 = arith.constant 0 : i32
    %c0_i32_0 = arith.constant 0 : i32
    %c0_i32_1 = arith.constant 0 : i32
    return %c0_i32, %c0_i32_0 : i32, i32
  }
  func.func @transform_8(%arg0: i32) -> (i32, i32, i32) {
    %c0_i32 = arith.constant 0 : i32
    %c0_i32_0 = arith.constant 0 : i32
    %c0_i32_1 = arith.constant 0 : i32
    %c0_i32_2 = arith.constant 0 : i32
    return %c0_i32, %c0_i32_0, %c0_i32_1 : i32, i32, i32
  }
  func.func @transform_9(%arg0: i32) -> (i32, i32, i32) {
    %c0_i32 = arith.constant 0 : i32
    %c0_i32_0 = arith.constant 0 : i32
    %c0_i32_1 = arith.constant 0 : i32
    %c0_i32_2 = arith.constant 0 : i32
    return %c0_i32, %c0_i32_0, %c0_i32_1 : i32, i32, i32
  }
  func.func @transform_10(%arg0: i32) -> (i32, i32) {
    %c0_i32 = arith.constant 0 : i32
    %c0_i32_0 = arith.constant 0 : i32
    %c0_i32_1 = arith.constant 0 : i32
    return %c0_i32, %c0_i32_0 : i32, i32
  }
  func.func @transform_11(%arg0: i32) -> (i32, i32, i32) {
    %c0_i32 = arith.constant 0 : i32
    %c0_i32_0 = arith.constant 0 : i32
    %c0_i32_1 = arith.constant 0 : i32
    %c0_i32_2 = arith.constant 0 : i32
    return %c0_i32, %c0_i32_0, %c0_i32_1 : i32, i32, i32
  }
  func.func @transform_12(%arg0: i32) -> (i32, i32, i32) {
    %c0_i32 = arith.constant 0 : i32
    %c0_i32_0 = arith.constant 0 : i32
    %c0_i32_1 = arith.constant 0 : i32
    %c0_i32_2 = arith.constant 0 : i32
    return %c0_i32, %c0_i32_0, %c0_i32_1 : i32, i32, i32
  }
  func.func @transform_13(%arg0: i32) -> (i32, i32, i32) {
    %c0_i32 = arith.constant 0 : i32
    %c0_i32_0 = arith.constant 0 : i32
    %c0_i32_1 = arith.constant 0 : i32
    return %arg0, %c0_i32, %c0_i32_0 : i32, i32, i32
  }
}

</mosaic_0001>

<bundles_post_ra>
// kernel: tile.18
= control target key start
LH: loop header
LB: loop body
LE: loop exit
PB: predicated region body
PF: predicated region fallthrough
CT: control target
= control target key end

     0   :  { %s28_s0 = inlined_call_operand.vmem [shape: f32[4], index: 0, kind: input, shape index: {}]   ;;  %s29_s1 = inlined_call_operand.vmem [shape: f32[16,4], index: 1, kind: output, shape index: {}]  }
   0x1   :  { %v4_v0 = vld [vmem:[%s28_s0] ss:$0 sm:$0xff] }
   0x2   :  { %5 = vst [vmem:[%s29_s1] sm:$0xff] %v4_v0  ;;  %8 = vst [vmem:[%s29_s1 + $0x8] sm:$0xff] %v4_v0 }

// kernel: tile.19
= control target key start
LH: loop header
LB: loop body
LE: loop exit
PB: predicated region body
PF: predicated region fallthrough
CT: control target
= control target key end

     0   :  { %s133_s10 = smov 60   ;;  %s134_s11 = smov 52   ;;  %vm3_vm0 = vcmask 31744   ;;  %vm9_vm1 = vcmask 523744   ;;  %vm15_vm2 = vcmask 490944   ;;  %vm21_vm3 = vcmask 458144   ;;  %s209_s0 = inlined_call_operand.vmem [shape: f32[16,4], index: 0, kind: input, shape index: {}]   ;;  %s210_s1 = inlined_call_operand.vmem [shape: f32[1,64], index: 1, kind: output, shape index: {}]  }
   0x1   :  { %v103_v0 = vld [vmem:[%s209_s0 + $0xf] sm:$0x1]   ;;  %v105_v1 = vld [vmem:[%s209_s0 + $0xd] sm:$0x1]   ;;  %v104_v2 = vld [vmem:[%s209_s0 + $0xe] sm:$0x1]  }
   0x2   :  { %7 = vrot.lane.b32.xlu0 %v103_v0, %s133_s10  ;;  %19 = vrot.lane.b32.xlu1 %v105_v1, %s134_s11  ;;  %v106_v3 = vld [vmem:[%s209_s0 + $0xc] sm:$0x1]   ;;  %s135_s16 = smov 56   ;;  %s136_s17 = smov 48   ;;  %v107_v4 = vld [vmem:[%s209_s0 + $0xb] sm:$0x1]  }
   0x3   :  { %v108_v5 = vld [vmem:[%s209_s0 + $0xa] sm:$0x1]   ;;  %v2_v6 = vld [vmem:[%s209_s0] sm:$0x1]   ;;  %s137_s24 = smov 44   ;;  %s138_s25 = smov 40  }
   0x4   :  { %4 = vst.msk [vmem:[#allocation0] sm:$0x1] %vm3_vm0, %v2_v6   ;;  %v109_v7 = vld [vmem:[%s209_s0 + $0x9] sm:$0x1]   ;;  %v110_v8 = vld [vmem:[%s209_s0 + $0x8] sm:$0x1]  }
   0x5   :  { %s139_s30 = smov 36   ;;  %s140_s2 = smov 32   ;;  %v111_v9 = vld [vmem:[%s209_s0 + $0x7] sm:$0x1]   ;;  %v112_v10 = vld [vmem:[%s209_s0 + $0x6] sm:$0x1]  }
   0x6   :  { %13 = vrot.lane.b32.xlu0 %v104_v2, %s135_s16  ;;  %25 = vrot.lane.b32.xlu1 %v106_v3, %s136_s17  ;;  %s141_s7 = smov 28   ;;  %s142_s8 = smov 24   ;;  %v113_v11 = vld [vmem:[%s209_s0 + $0x5] sm:$0x1]   ;;  %v114_v12 = vld [vmem:[%s209_s0 + $0x4] sm:$0x1]  }
   0x7   :  { %s143_s13 = smov 20   ;;  %s144_s14 = smov 16   ;;  %v115_v13 = vld [vmem:[%s209_s0 + $0x3] sm:$0x1]   ;;  %v116_v14 = vld [vmem:[%s209_s0 + $0x2] sm:$0x1]  }
   0x8   :  { %s145_s19 = smov 12   ;;  %s146_s20 = smov 8   ;;  %v117_v15 = vld [vmem:[%s209_s0 + $0x1] sm:$0x1]   ;;  %vm27_vm4 = vcmask 425344   ;;  %vm33_vm5 = vcmask 392544  }
   0x9   :  { %s147_s0 = smov 4   ;;  %vm39_vm6 = vcmask 359744   ;;  %vm45_vm7 = vcmask 326944   ;;  %vm51_vm8 = vcmask 294144   ;;  %vm57_vm9 = vcmask 261344  }
   0xa   :  { %31 = vrot.lane.b32.xlu0 %v107_v4, %s137_s24  ;;  %37 = vrot.lane.b32.xlu1 %v108_v5, %s138_s25  ;;  %vm63_vm10 = vcmask 228544   ;;  %vm69_vm11 = vcmask 195744   ;;  %vm75_vm12 = vcmask 162944   ;;  %vm81_vm13 = vcmask 130144  }
   0xb   :  { %vm87_vm14 = vcmask 97344   ;;  %vm93_vm15 = vcmask 64544  }
   0xe   :  { %43 = vrot.lane.b32.xlu0 %v109_v7, %s139_s30  ;;  %49 = vrot.lane.b32.xlu1 %v110_v8, %s140_s2 }
  0x12   :  { %55 = vrot.lane.b32.xlu0 %v111_v9, %s141_s7  ;;  %61 = vrot.lane.b32.xlu1 %v112_v10, %s142_s8 }
  0x16   :  { %67 = vrot.lane.b32.xlu0 %v113_v11, %s143_s13  ;;  %73 = vrot.lane.b32.xlu1 %v114_v12, %s144_s14 }
  0x1a   :  { %79 = vrot.lane.b32.xlu0 %v115_v13, %s145_s19  ;;  %85 = vrot.lane.b32.xlu1 %v116_v14, %s146_s20 }
  0x1e   :  { %91 = vrot.lane.b32.xlu0 %v117_v15, %s147_s0 }
  0x74   :  { %v8_v16 = vpop.permute.xlu0 %7   ;;  %v20_v17 = vpop.permute.xlu1 %19  }
  0x75   :  { %10 = vst.msk [vmem:[#allocation0] sm:$0x1] %vm9_vm1, %v8_v16  }
  0x78   :  { %v14_v18 = vpop.permute.xlu0 %13   ;;  %v26_v19 = vpop.permute.xlu1 %25  }
  0x79   :  { %16 = vst.msk [vmem:[#allocation0] sm:$0x1] %vm15_vm2, %v14_v18  }
  0x7a   :  { %22 = vst.msk [vmem:[#allocation0] sm:$0x1] %vm21_vm3, %v20_v17  }
  0x7b   :  { %28 = vst.msk [vmem:[#allocation0] sm:$0x1] %vm27_vm4, %v26_v19  }
  0x7c   :  { %v32_v20 = vpop.permute.xlu0 %31   ;;  %v38_v21 = vpop.permute.xlu1 %37  }
  0x7d   :  { %34 = vst.msk [vmem:[#allocation0] sm:$0x1] %vm33_vm5, %v32_v20  }
  0x7e   :  { %40 = vst.msk [vmem:[#allocation0] sm:$0x1] %vm39_vm6, %v38_v21  }
  0x80   :  { %v44_v22 = vpop.permute.xlu0 %43   ;;  %v50_v23 = vpop.permute.xlu1 %49  }
  0x81   :  { %46 = vst.msk [vmem:[#allocation0] sm:$0x1] %vm45_vm7, %v44_v22  }
  0x82   :  { %52 = vst.msk [vmem:[#allocation0] sm:$0x1] %vm51_vm8, %v50_v23  }
  0x84   :  { %v56_v24 = vpop.permute.xlu0 %55   ;;  %v62_v25 = vpop.permute.xlu1 %61  }
  0x85   :  { %58 = vst.msk [vmem:[#allocation0] sm:$0x1] %vm57_vm9, %v56_v24  }
  0x86   :  { %64 = vst.msk [vmem:[#allocation0] sm:$0x1] %vm63_vm10, %v62_v25  }
  0x88   :  { %v68_v26 = vpop.permute.xlu0 %67   ;;  %v74_v27 = vpop.permute.xlu1 %73  }
  0x89   :  { %70 = vst.msk [vmem:[#allocation0] sm:$0x1] %vm69_vm11, %v68_v26  }
  0x8a   :  { %76 = vst.msk [vmem:[#allocation0] sm:$0x1] %vm75_vm12, %v74_v27  }
  0x8c   :  { %v80_v28 = vpop.permute.xlu0 %79   ;;  %v86_v29 = vpop.permute.xlu1 %85  }
  0x8d   :  { %82 = vst.msk [vmem:[#allocation0] sm:$0x1] %vm81_vm13, %v80_v28  }
  0x8e   :  { %88 = vst.msk [vmem:[#allocation0] sm:$0x1] %vm87_vm14, %v86_v29  }
  0x90   :  { %v92_v30 = vpop.permute.xlu0 %91  }
  0x91   :  { %94 = vst.msk [vmem:[#allocation0] sm:$0x1] %vm93_vm15, %v92_v30  }
  0x98   :  { %v99_v31 = vld [vmem:[#allocation0] sm:$0x1] }
  0x99   :  { %102 = vst [vmem:[%s210_s1] sm:$0x1] %v99_v31 }

// kernel: tile.28
= control target key start
LH: loop header
LB: loop body
LE: loop exit
PB: predicated region body
PF: predicated region fallthrough
CT: control target
= control target key end

     0   :  { %s22_s0 = inlined_call_operand.vmem [shape: f32[16], index: 0, kind: input, shape index: {}]   ;;  %s23_s1 = inlined_call_operand.vmem [shape: f32[8,16], index: 1, kind: output, shape index: {}]  }
   0x1   :  { %v4_v0 = vld [vmem:[%s22_s0] ss:$0 sm:$0xff] }
   0x2   :  { %5 = vst [vmem:[%s23_s1] sm:$0xff] %v4_v0 }

// kernel: tile.29
= control target key start
LH: loop header
LB: loop body
LE: loop exit
PB: predicated region body
PF: predicated region fallthrough
CT: control target
= control target key end

     0   :  { %s69_s10 = smov 112   ;;  %s70_s11 = smov 80   ;;  %vm3_vm0 = vcmask 130048   ;;  %vm9_vm1 = vcmask 1048448   ;;  %vm15_vm2 = vcmask 917248   ;;  %vm21_vm3 = vcmask 786048   ;;  %s113_s0 = inlined_call_operand.vmem [shape: f32[8,16], index: 0, kind: input, shape index: {}]   ;;  %s114_s1 = inlined_call_operand.vmem [shape: f32[1,128], index: 1, kind: output, shape index: {}]  }
   0x1   :  { %v55_v0 = vld [vmem:[%s113_s0 + $0x7] sm:$0x1]   ;;  %v57_v1 = vld [vmem:[%s113_s0 + $0x5] sm:$0x1]   ;;  %v56_v2 = vld [vmem:[%s113_s0 + $0x6] sm:$0x1]  }
   0x2   :  { %7 = vrot.lane.b32.xlu0 %v55_v0, %s69_s10  ;;  %19 = vrot.lane.b32.xlu1 %v57_v1, %s70_s11  ;;  %v58_v3 = vld [vmem:[%s113_s0 + $0x4] sm:$0x1]   ;;  %v2_v4 = vld [vmem:[%s113_s0] sm:$0x1]   ;;  %s71_s18 = smov 96   ;;  %s72_s19 = smov 64  }
   0x3   :  { %4 = vst.msk [vmem:[#allocation0] sm:$0x1] %vm3_vm0, %v2_v4   ;;  %v59_v5 = vld [vmem:[%s113_s0 + $0x3] sm:$0x1]   ;;  %v60_v6 = vld [vmem:[%s113_s0 + $0x2] sm:$0x1]  }
   0x4   :  { %s73_s24 = smov 48   ;;  %s74_s25 = smov 32   ;;  %v61_v7 = vld [vmem:[%s113_s0 + $0x1] sm:$0x1]   ;;  %vm27_vm4 = vcmask 654848   ;;  %vm33_vm5 = vcmask 523648  }
   0x5   :  { %s75_s0 = smov 16   ;;  %vm39_vm6 = vcmask 392448   ;;  %vm45_vm7 = vcmask 261248  }
   0x6   :  { %13 = vrot.lane.b32.xlu0 %v56_v2, %s71_s18  ;;  %25 = vrot.lane.b32.xlu1 %v58_v3, %s72_s19 }
   0xa   :  { %31 = vrot.lane.b32.xlu0 %v59_v5, %s73_s24  ;;  %37 = vrot.lane.b32.xlu1 %v60_v6, %s74_s25 }
   0xe   :  { %43 = vrot.lane.b32.xlu0 %v61_v7, %s75_s0 }
  0x74   :  { %v8_v8 = vpop.permute.xlu0 %7   ;;  %v20_v9 = vpop.permute.xlu1 %19  }
  0x75   :  { %10 = vst.msk [vmem:[#allocation0] sm:$0x1] %vm9_vm1, %v8_v8  }
  0x78   :  { %v14_v10 = vpop.permute.xlu0 %13   ;;  %v26_v11 = vpop.permute.xlu1 %25  }
  0x79   :  { %16 = vst.msk [vmem:[#allocation0] sm:$0x1] %vm15_vm2, %v14_v10  }
  0x7a   :  { %22 = vst.msk [vmem:[#allocation0] sm:$0x1] %vm21_vm3, %v20_v9  }
  0x7b   :  { %28 = vst.msk [vmem:[#allocation0] sm:$0x1] %vm27_vm4, %v26_v11  }
  0x7c   :  { %v32_v12 = vpop.permute.xlu0 %31   ;;  %v38_v13 = vpop.permute.xlu1 %37  }
  0x7d   :  { %34 = vst.msk [vmem:[#allocation0] sm:$0x1] %vm33_vm5, %v32_v12  }
  0x7e   :  { %40 = vst.msk [vmem:[#allocation0] sm:$0x1] %vm39_vm6, %v38_v13  }
  0x80   :  { %v44_v14 = vpop.permute.xlu0 %43  }
  0x81   :  { %46 = vst.msk [vmem:[#allocation0] sm:$0x1] %vm45_vm7, %v44_v14  }
  0x88   :  { %v51_v15 = vld [vmem:[#allocation0] sm:$0x1] }
  0x89   :  { %54 = vst [vmem:[%s114_s1] sm:$0x1] %v51_v15 }

// kernel: hf_block_forward.1
= control target key start
LH: loop header
LB: loop body
LE: loop exit
PB: predicated region body
PF: predicated region fallthrough
CT: control target
= control target key end

     0   :  { %s3179_s25 = smov 0   ;;  %s3720_s0 = inlined_call_operand.vmem [shape: f32[2,16,64], index: 0, kind: input, shape index: {}]   ;;  %s3721_s1 = inlined_call_operand.vmem [shape: f32[3,16,16], index: 1, kind: input, shape index: {}]   ;;  %s3722_s2 = inlined_call_operand.vmem [shape: f32[3,64,64], index: 2, kind: input, shape index: {}]   ;;  %s3723_s3 = inlined_call_operand.vmem [shape: f32[1,64], index: 3, kind: input, shape index: {}]   ;;  %s3724_s4 = inlined_call_operand.vmem [shape: f32[3,64,64], index: 4, kind: input, shape index: {}]   ;;  %s3725_s5 = inlined_call_operand.vmem [shape: f32[1,64], index: 5, kind: input, shape index: {}]   ;;  %s3726_s6 = inlined_call_operand.vmem [shape: f32[8,16], index: 6, kind: input, shape index: {}]   ;;  %s3727_s7 = inlined_call_operand.vmem [shape: f32[64,32], index: 7, kind: input, shape index: {}]   ;;  %s3728_s8 = inlined_call_operand.vmem [shape: f32[3,8,8], index: 8, kind: input, shape index: {}]   ;;  %s3729_s9 = inlined_call_operand.vmem [shape: f32[3,32,128], index: 9, kind: input, shape index: {}]   ;;  %s3730_s10 = inlined_call_operand.vmem [shape: f32[1,128], index: 10, kind: input, shape index: {}]   ;;  %s3731_s11 = inlined_call_operand.vmem [shape: f32[2,128,64], index: 11, kind: input, shape index: {}]   ;;  %s3732_s12 = inlined_call_operand.vmem [shape: f32[2,16,8], index: 12, kind: input, shape index: {}]   ;;  %s3733_s13 = inlined_call_operand.vmem [shape: f32[2,16,64], index: 13, kind: output, shape index: {}]  }
   0x1 LB: > { %s2506_s26 = sadd.s32 4294967295, %s3105_s25   ;;  %p2510_p0 = scmp.ge.s32.totalorder %s3105_s25, 1  ;;  %s3105_s25 = sphi %s3179_s25, %s23_s25  }
   0x2   : > { %p387_p1 = scmp.lt.s32.totalorder %s3105_s25, 3 }
   0x4   : > { %p388_p2 = pnand %p2510_p0, %p387_p1 }
   0x5   : > { %p431_p3 = scmp.lt.s32.totalorder (!%p388_p2), %s2506_s26, 1 }
   0x6   : > { %391 = sbr.rel (%p388_p2) target bundleno = 2597 (0xa25), region = 72 }
   0xb   : > { %v3190_v0 = vld [vmem:[%s3721_s1] sm:$0xff]  ;;  %vm445_vm0 = vcmask 130048   ;;  %v3195_v1 = vld [vmem:[%s3721_s1 + $0x10] sm:$0xff]  ;;  %s3735_s26 = smov (!%p431_p3, %s2506_s26), 1  ;;  %v3220_v4 = vld [vmem:[%s3721_s1 + $0x8] sm:$0xff]  ;;  %vm628_vm1 = vcmask 523264  }
   0xc   : > { %2783 = vmatprep.mubr.msk.f32.mxu0 %vm445_vm0, %v3190_v0  ;;  %2790 = vmatprep.mubr.msk.f32.mxu1 %vm445_vm0, %v3195_v1  ;;  %s2620_s14 = sshll.u32 %s3735_s26, 4  ;;  %v3225_v5 = vld [vmem:[%s3721_s1 + $0x18] sm:$0xff]  ;;  %v2527_v8 = vld [vmem:[%s3722_s2 + $0x70] sm:$0xff]  ;;  %v2526_v10 = vld [vmem:[%s3722_s2 + $0x68] sm:$0xff]  ;;  %vm3108_vm2 = vmmov 0   ;;  %vm1640_vm3 = vcmask 64512  }
   0xd   : > { %s435_s17 = scalar_lea.vmem %s3720_s0, %s2620_s14  ;;  %v2528_v6 = vld [vmem:[%s3722_s2 + $0x78] sm:$0xff]  ;;  %v533_v9 = vld [vmem:[%s3722_s2 + $0x30] sm:$0xff]  ;;  %v532_v11 = vld [vmem:[%s3722_s2 + $0x28] sm:$0xff]  ;;  %vm1798_vm4 = vcmask 261120   ;;  %s440_s28 = scalar_lea.vmem %s3733_s13, %s2620_s14 }
   0xe   : > { %v3209_v2 = vld [vmem:[%s435_s17 + $0x8] sm:$0xff]  ;;  %v3211_v3 = vld [vmem:[%s435_s17] sm:$0xff]  ;;  %v534_v7 = vld [vmem:[%s3722_s2 + $0x38] sm:$0xff] }
   0xf   : > { %2779 = vmatprep.subr.mxu0 %v3209_v2  ;;  %2786 = vmatprep.subr.mxu1 %v3209_v2  ;;  %v2525_v12 = vld [vmem:[%s3722_s2 + $0x60] sm:$0xff]  ;;  %v2524_v14 = vld [vmem:[%s3722_s2 + $0x58] sm:$0xff]  ;;  %v2523_v16 = vld [vmem:[%s3722_s2 + $0x50] sm:$0xff] }
  0x10   : > { %2780 = vmatpush3.msra.mxu0 %v3209_v2  ;;  %2787 = vmatpush3.msra.mxu1 %v3209_v2  ;;  %v531_v13 = vld [vmem:[%s3722_s2 + $0x20] sm:$0xff]  ;;  %v530_v15 = vld [vmem:[%s3722_s2 + $0x18] sm:$0xff]  ;;  %v529_v17 = vld [vmem:[%s3722_s2 + $0x10] sm:$0xff] }
  0x11   : > { %2781 = vmatprep.subr.mxu0 %v3211_v3  ;;  %2788 = vmatprep.subr.mxu1 %v3211_v3  ;;  %v2522_v18 = vld [vmem:[%s3722_s2 + $0x48] sm:$0xff]  ;;  %v2521_v20 = vld [vmem:[%s3722_s2 + $0x40] sm:$0xff]  ;;  %v2544_v22 = vld [vmem:[%s3722_s2 + $0xb8] sm:$0xff] }
  0x12   : > { %2782 = vmatpush3.msra.mxu0 %v3211_v3  ;;  %2789 = vmatpush3.msra.mxu1 %v3211_v3  ;;  %v528_v19 = vld [vmem:[%s3722_s2 + $0x8] sm:$0xff]  ;;  %v527_v21 = vld [vmem:[%s3722_s2] sm:$0xff]  ;;  %v2543_v28 = vld [vmem:[%s3722_s2 + $0xb0] sm:$0xff] }
  0x13   : > { %2784 = vmatmul.mubr.msk.f32.vlgmr.msra.gmra.mxu0 %vm445_vm0, %v3220_v4  ;;  %2791 = vmatmul.mubr.msk.f32.vlgmr.msra.gmra.mxu1 %vm445_vm0, %v3225_v5  ;;  %v3290_v27 = vld [vmem:[%s3721_s1 + $0x20] sm:$0xff]  ;;  %v3305_v29 = vld [vmem:[%s3721_s1 + $0x28] sm:$0xff]  ;;  %v2540_v32 = vld [vmem:[%s3722_s2 + $0x98] sm:$0xff] }
  0x14   : > { %2793 = vmatprep.subr.mxu0 %v2528_v6  ;;  %2812 = vmatprep.subr.mxu1 %v534_v7  ;;  %v2542_v30 = vld [vmem:[%s3722_s2 + $0xa8] sm:$0xff]  ;;  %v2541_v31 = vld [vmem:[%s3722_s2 + $0xa0] sm:$0xff]  ;;  %v2539_v33 = vld [vmem:[%s3722_s2 + $0x90] sm:$0xff] }
  0x15   : > { %2794 = vmatpush3.msra.mxu0 %v2528_v6  ;;  %2813 = vmatpush3.msra.mxu1 %v534_v7  ;;  %v2538_v34 = vld [vmem:[%s3722_s2 + $0x88] sm:$0xff]  ;;  %v2537_v35 = vld [vmem:[%s3722_s2 + $0x80] sm:$0xff]  ;;  %v1060_v40 = vld [vmem:[%s3724_s4 + $0x38] sm:$0xff] }
  0x16   : > { %2795 = vmatprep.subr.mxu0 %v2527_v8  ;;  %2814 = vmatprep.subr.mxu1 %v533_v9  ;;  %v1059_v41 = vld [vmem:[%s3724_s4 + $0x30] sm:$0xff]  ;;  %v1058_v42 = vld [vmem:[%s3724_s4 + $0x28] sm:$0xff]  ;;  %v1057_v43 = vld [vmem:[%s3724_s4 + $0x20] sm:$0xff] }
  0x17   : > { %2796 = vmatpush3.msra.mxu0 %v2527_v8  ;;  %2815 = vmatpush3.msra.mxu1 %v533_v9  ;;  %v1056_v44 = vld [vmem:[%s3724_s4 + $0x18] sm:$0xff]  ;;  %v1055_v45 = vld [vmem:[%s3724_s4 + $0x10] sm:$0xff]  ;;  %v2547_v50 = vld [vmem:[%s3723_s3] ss:$0 sm:$0xff] }
  0x18   : > { %2797 = vmatprep.subr.mxu0 %v2526_v10  ;;  %2816 = vmatprep.subr.mxu1 %v532_v11  ;;  %v2559_v59 = vld [vmem:[%s3724_s4 + $0x78] sm:$0xff]  ;;  %v2558_v60 = vld [vmem:[%s3724_s4 + $0x70] sm:$0xff]  ;;  %v2557_v61 = vld [vmem:[%s3724_s4 + $0x68] sm:$0xff] }
  0x19   : > { %2798 = vmatpush3.msra.mxu0 %v2526_v10  ;;  %2817 = vmatpush3.msra.mxu1 %v532_v11  ;;  %v2556_v62 = vld [vmem:[%s3724_s4 + $0x60] sm:$0xff]  ;;  %v2555_v63 = vld [vmem:[%s3724_s4 + $0x58] sm:$0xff]  ;;  %v2572_v10 = vld [vmem:[%s3724_s4 + $0xb0] sm:$0xff] }
  0x1a   : > { %2799 = vmatprep.subr.mxu0 %v2525_v12  ;;  %2818 = vmatprep.subr.mxu1 %v531_v13  ;;  %v2573_v9 = vld [vmem:[%s3724_s4 + $0xb8] sm:$0xff]  ;;  %v2571_v11 = vld [vmem:[%s3724_s4 + $0xa8] sm:$0xff] }
  0x1b   : > { %2800 = vmatpush3.msra.mxu0 %v2525_v12  ;;  %2819 = vmatpush3.msra.mxu1 %v531_v13  ;;  %v2570_v12 = vld [vmem:[%s3724_s4 + $0xa0] sm:$0xff]  ;;  %v2569_v13 = vld [vmem:[%s3724_s4 + $0x98] sm:$0xff] }
  0x1c   : > { %2801 = vmatprep.subr.mxu0 %v2524_v14  ;;  %2820 = vmatprep.subr.mxu1 %v530_v15 }
  0x1d   : > { %2802 = vmatpush3.msra.mxu0 %v2524_v14  ;;  %2821 = vmatpush3.msra.mxu1 %v530_v15  ;;  %v2568_v14 = vld [vmem:[%s3724_s4 + $0x90] sm:$0xff]  ;;  %v2567_v15 = vld [vmem:[%s3724_s4 + $0x88] sm:$0xff] }
  0x1e   : > { %2803 = vmatprep.subr.mxu0 %v2523_v16  ;;  %2822 = vmatprep.subr.mxu1 %v529_v17 }
  0x1f   : > { %2804 = vmatpush3.msra.mxu0 %v2523_v16  ;;  %2823 = vmatpush3.msra.mxu1 %v529_v17  ;;  %v2566_v16 = vld [vmem:[%s3724_s4 + $0x80] sm:$0xff] }
  0x20   : > { %2805 = vmatprep.subr.mxu0 %v2522_v18  ;;  %2824 = vmatprep.subr.mxu1 %v528_v19 }
  0x21   : > { %2806 = vmatpush3.msra.mxu0 %v2522_v18  ;;  %2825 = vmatpush3.msra.mxu1 %v528_v19 }
  0x22   : > { %2807 = vmatprep.subr.mxu0 %v2521_v20  ;;  %2826 = vmatprep.subr.mxu1 %v527_v21 }
  0x23   : > { %2808 = vmatpush3.msra.mxu0 %v2521_v20  ;;  %2827 = vmatpush3.msra.mxu1 %v527_v21  ;;  %v3107_v21 = vmov 0.0  }
  0x24   : > { %2831 = vmatprep.subr.mxu0 %v3209_v2  ;;  %2838 = vmatprep.subr.mxu1 %v2544_v22 }
  0xd3   : > { %v2785_v23 = vpop.f32.mrf.mxu0  ;;  %v2792_v24 = vpop.f32.mrf.mxu1 }
  0xd5   : > { %v518_v25 = vpop.f32.mrf.mxu0  ;;  %v610_v26 = vpop.f32.mrf.mxu1 }
  0xd6   : > { %2809 = vmatprep.mubr.msk.f32.mxu0 %vm628_vm1, %v610_v26  ;;  %2828 = vmatprep.mubr.msk.f32.mxu1 %vm628_vm1, %v518_v25  ;;  %v2576_v26 = vld [vmem:[%s3725_s5] ss:$0 sm:$0xff] }
  0xd7   : > { %2810 = vmatmul.mubr.msk.f32.vlgmr.msra.gmra.mxu0 %vm628_vm1, %v2792_v24  ;;  %2829 = vmatmul.mubr.msk.f32.vlgmr.msra.gmra.mxu1 %vm628_vm1, %v2785_v23 }
  0xd8   : > { %2832 = vmatpush3.msra.mxu0 %v3209_v2  ;;  %2835 = vmatprep.mubr.msk.f32.mxu0 %vm445_vm0, %v3290_v27  ;;  %v2552_v2 = vld [vmem:[%s3724_s4 + $0x40] sm:$0xff] }
  0xd9   : > { %2833 = vmatprep.subr.mxu0 %v3211_v3  ;;  %2839 = vmatpush3.msra.mxu1 %v2544_v22 }
  0xda   : > { %2834 = vmatpush3.msra.mxu0 %v3211_v3  ;;  %2840 = vmatprep.subr.mxu1 %v2543_v28  ;;  %v1054_v3 = vld [vmem:[%s3724_s4 + $0x8] sm:$0xff] }
  0xdb   : > { %2836 = vmatmul.mubr.msk.f32.vlgmr.msra.gmra.mxu0 %vm445_vm0, %v3305_v29  ;;  %2841 = vmatpush3.msra.mxu1 %v2543_v28 }
  0xdc   : > { %2842 = vmatprep.subr.mxu1 %v2542_v30  ;;  %2861 = vmatprep.mubr.msk.f32.mxu0 %vm445_vm0, %v3190_v0  ;;  %v2554_v0 = vld [vmem:[%s3724_s4 + $0x50] sm:$0xff] }
  0xdd   : > { %2843 = vmatpush3.msra.mxu1 %v2542_v30 }
  0xde   : > { %2844 = vmatprep.subr.mxu1 %v2541_v31 }
  0xdf   : > { %2845 = vmatpush3.msra.mxu1 %v2541_v31 }
  0xe0   : > { %2846 = vmatprep.subr.mxu1 %v2540_v32 }
  0xe1   : > { %2847 = vmatpush3.msra.mxu1 %v2540_v32 }
  0xe2   : > { %2848 = vmatprep.subr.mxu1 %v2539_v33 }
  0xe3   : > { %2849 = vmatpush3.msra.mxu1 %v2539_v33  ;;  %v1483_v33 = vld [vmem:[%s3726_s6] sm:$0xff] }
  0xe4   : > { %2850 = vmatprep.subr.mxu1 %v2538_v34 }
  0xe5   : > { %2851 = vmatpush3.msra.mxu1 %v2538_v34  ;;  %v1564_v34 = vld [vmem:[%s3727_s7 + $0x38] sm:$0xff] }
  0xe6   : > { %2852 = vmatprep.subr.mxu1 %v2537_v35 }
  0xe7   : > { %2853 = vmatpush3.msra.mxu1 %v2537_v35  ;;  %v1563_v35 = vld [vmem:[%s3727_s7 + $0x30] sm:$0xff] }
  0xe8   : > { %2890 = vmatprep.subr.mxu1 %v1060_v40 }
 0x197   : > { %v2811_v36 = vpop.f32.mrf.mxu0  ;;  %v2830_v46 = vpop.f32.mrf.mxu1 }
 0x198   : > { %v788_v48 = vadd.f32 %v2830_v46, %v2811_v36  ;;  %v1562_v36 = vld [vmem:[%s3727_s7 + $0x28] sm:$0xff] }
 0x199   : > { %v701_v37 = vpop.f32.mrf.mxu0  ;;  %v782_v47 = vpop.f32.mrf.mxu1 }
 0x19a   : > { %v783_v51 = vadd.f32 %v782_v47, %v701_v37  ;;  %v1561_v37 = vld [vmem:[%s3727_s7 + $0x20] sm:$0xff] }
 0x19b   : > { %v2837_v38 = vpop.f32.mrf.mxu0 }
 0x19d   : > { %v866_v39 = vpop.f32.mrf.mxu0 }
 0x19e   : > { %2854 = vmatprep.mubr.msk.f32.mxu1 %vm628_vm1, %v866_v39  ;;  %v1559_v39 = vld [vmem:[%s3727_s7 + $0x10] sm:$0xff] }
 0x19f   : > { %2855 = vmatmul.mubr.msk.f32.vlgmr.msra.gmra.mxu1 %vm628_vm1, %v2837_v38  ;;  %v1560_v38 = vld [vmem:[%s3727_s7 + $0x18] sm:$0xff] }
 0x1a0   : > { %2891 = vmatpush3.msra.mxu1 %v1060_v40  ;;  %v1558_v40 = vld [vmem:[%s3727_s7 + $0x8] sm:$0xff] }
 0x1a1   : > { %2892 = vmatprep.subr.mxu1 %v1059_v41 }
 0x1a2   : > { %2893 = vmatpush3.msra.mxu1 %v1059_v41  ;;  %v1557_v41 = vld [vmem:[%s3727_s7] sm:$0xff] }
 0x1a3   : > { %2894 = vmatprep.subr.mxu1 %v1058_v42 }
 0x1a4   : > { %2895 = vmatpush3.msra.mxu1 %v1058_v42 }
 0x1a5   : > { %2896 = vmatprep.subr.mxu1 %v1057_v43 }
 0x1a6   : > { %2897 = vmatpush3.msra.mxu1 %v1057_v43 }
 0x1a7   : > { %2898 = vmatprep.subr.mxu1 %v1056_v44 }
 0x1a8   : > { %2899 = vmatpush3.msra.mxu1 %v1056_v44  ;;  %v2585_v44 = vld [vmem:[%s3729_s9 + $0x38] sm:$0xff] }
 0x1a9   : > { %2900 = vmatprep.subr.mxu1 %v1055_v45 }
 0x1aa   : > { %2901 = vmatpush3.msra.mxu1 %v1055_v45  ;;  %v2584_v45 = vld [vmem:[%s3729_s9 + $0x30] sm:$0xff] }
 0x1ab   : > { %2902 = vmatprep.subr.mxu1 %v1054_v3 }
 0x1ac   : > { %2903 = vmatpush3.msra.mxu1 %v1054_v3  ;;  %v2123_v3 = vld [vmem:[%s3731_s11 + $0x70] sm:$0xff] }
 0x25f   : > { %v2856_v49 = vpop.f32.mrf.mxu1 }
 0x260   : > { %v966_v52 = vadd.f32 %v2856_v49, %v788_v48  ;;  %v1639_v48 = vld [vmem:[%s3728_s8] sm:$0xff] }
 0x261   : > { %v956_v53 = vpop.f32.mrf.mxu1 }
 0x262   : > { %v975_v54 = vadd.f32 %v2547_v50, %v966_v52  ;;  %v965_v55 = vadd.f32 %v956_v53, %v783_v51  ;;  %v1717_v51 = vld [vmem:[%s3729_s9 + $0x18] sm:$0xff]  ;;  %v1716_v52 = vld [vmem:[%s3729_s9 + $0x10] sm:$0xff]  ;;  %v1715_v53 = vld [vmem:[%s3729_s9 + $0x8] sm:$0xff] }
 0x264   : > { %v977_v56 = vmax.f32 %v975_v54, 0.0  ;;  %v974_v57 = vadd.f32 %v2547_v50, %v965_v55  ;;  %v2580_v50 = vld [vmem:[%s3728_s8 + $0x8] sm:$0xff]  ;;  %v1714_v54 = vld [vmem:[%s3729_s9] sm:$0xff] }
 0x265   : > { %v2583_v55 = vld [vmem:[%s3729_s9 + $0x28] sm:$0xff] }
 0x266   : > { %v976_v58 = vmax.f32 %v974_v57, 0.0  ;;  %2857 = vmatprep.subr.mxu0 %v977_v56 }
 0x267   : > { %2858 = vmatpush3.msra.mxu0 %v977_v56 }
 0x268   : > { %2859 = vmatprep.subr.mxu0 %v976_v58 }
 0x269   : > { %2860 = vmatpush3.msra.mxu0 %v976_v58 }
 0x26a   : > { %2862 = vmatmul.mubr.msk.f32.vlgmr.msra.gmra.mxu0 %vm445_vm0, %v3220_v4  ;;  %2864 = vmatprep.subr.mxu0 %v977_v56  ;;  %v1053_v4 = vld [vmem:[%s3724_s4] sm:$0xff] }
 0x26b   : > { %2865 = vmatpush3.msra.mxu0 %v977_v56  ;;  %2868 = vmatprep.mubr.msk.f32.mxu0 %vm445_vm0, %v3195_v1  ;;  %v2553_v1 = vld [vmem:[%s3724_s4 + $0x48] sm:$0xff] }
 0x26c   : > { %2866 = vmatprep.subr.mxu0 %v976_v58  ;;  %2904 = vmatprep.subr.mxu1 %v1053_v4 }
 0x26d   : > { %2867 = vmatpush3.msra.mxu0 %v976_v58  ;;  %2905 = vmatpush3.msra.mxu1 %v1053_v4  ;;  %v2122_v4 = vld [vmem:[%s3731_s11 + $0x68] sm:$0xff] }
 0x26e   : > { %2869 = vmatmul.mubr.msk.f32.vlgmr.msra.gmra.mxu0 %vm445_vm0, %v3225_v5  ;;  %2871 = vmatprep.subr.mxu0 %v2559_v59 }
 0x26f   : > { %2872 = vmatpush3.msra.mxu0 %v2559_v59  ;;  %2935 = vmatprep.subr.mxu1 %v3107_v21 }
 0x270   : > { %2873 = vmatprep.subr.mxu0 %v2558_v60 }
 0x271   : > { %2874 = vmatpush3.msra.mxu0 %v2558_v60 }
 0x272   : > { %2875 = vmatprep.subr.mxu0 %v2557_v61 }
 0x273   : > { %2876 = vmatpush3.msra.mxu0 %v2557_v61  ;;  %v2588_v61 = vld [vmem:[%s3728_s8 + $0x10] sm:$0xff] }
 0x274   : > { %2877 = vmatprep.subr.mxu0 %v2556_v62 }
 0x275   : > { %2878 = vmatpush3.msra.mxu0 %v2556_v62  ;;  %v2593_v62 = vld [vmem:[%s3729_s9 + $0x58] sm:$0xff] }
 0x276   : > { %2879 = vmatprep.subr.mxu0 %v2555_v63 }
 0x277   : > { %2880 = vmatpush3.msra.mxu0 %v2555_v63  ;;  %v2592_v63 = vld [vmem:[%s3729_s9 + $0x50] sm:$0xff] }
 0x278   : > { %2881 = vmatprep.subr.mxu0 %v2554_v0 }
 0x279   : > { %2882 = vmatpush3.msra.mxu0 %v2554_v0  ;;  %v2591_v0 = vld [vmem:[%s3729_s9 + $0x48] sm:$0xff] }
 0x27a   : > { %2883 = vmatprep.subr.mxu0 %v2553_v1 }
 0x27b   : > { %2884 = vmatpush3.msra.mxu0 %v2553_v1  ;;  %v2590_v1 = vld [vmem:[%s3729_s9 + $0x40] sm:$0xff] }
 0x27c   : > { %2885 = vmatprep.subr.mxu0 %v2552_v2 }
 0x27d   : > { %2886 = vmatpush3.msra.mxu0 %v2552_v2  ;;  %v2124_v2 = vld [vmem:[%s3731_s11 + $0x78] sm:$0xff] }
 0x27e   : > { %2909 = vmatprep.subr.mxu0 %v977_v56 }
 0x32a   : > { %v2863_v5 = vpop.f32.mrf.mxu0 }
 0x32c   : > { %v1044_v6 = vpop.f32.mrf.mxu0 }
 0x32d   : > { %2906 = vmatprep.mubr.msk.f32.mxu1 %vm628_vm1, %v1044_v6  ;;  %v2120_v6 = vld [vmem:[%s3731_s11 + $0x58] sm:$0xff] }
 0x32e   : > { %v2870_v7 = vpop.f32.mrf.mxu0  ;;  %2907 = vmatmul.mubr.msk.f32.vlgmr.msra.gmra.mxu1 %vm628_vm1, %v2863_v5  ;;  %v2121_v5 = vld [vmem:[%s3731_s11 + $0x60] sm:$0xff] }
 0x32f   : > { %2939 = vmatprep.mubr.msk.f32.mxu1 %vm3108_vm2, %v3107_v21 }
 0x330   : > { %v1127_v8 = vpop.f32.mrf.mxu0 }
 0x331   : > { %2887 = vmatprep.mubr.msk.f32.mxu0 %vm628_vm1, %v1127_v8  ;;  %v2118_v8 = vld [vmem:[%s3731_s11 + $0x48] sm:$0xff] }
 0x332   : > { %2888 = vmatmul.mubr.msk.f32.vlgmr.msra.gmra.mxu0 %vm628_vm1, %v2870_v7  ;;  %v2119_v7 = vld [vmem:[%s3731_s11 + $0x50] sm:$0xff] }
 0x333   : > { %2910 = vmatpush3.msra.mxu0 %v977_v56  ;;  %2913 = vmatprep.mubr.msk.f32.mxu0 %vm445_vm0, %v3290_v27  ;;  %v2582_v56 = vld [vmem:[%s3729_s9 + $0x20] sm:$0xff] }
 0x334   : > { %2911 = vmatprep.subr.mxu0 %v976_v58 }
 0x335   : > { %2912 = vmatpush3.msra.mxu0 %v976_v58 }
 0x336   : > { %2914 = vmatmul.mubr.msk.f32.vlgmr.msra.gmra.mxu0 %vm445_vm0, %v3305_v29  ;;  %2916 = vmatprep.subr.mxu0 %v2573_v9 }
 0x337   : > { %2917 = vmatpush3.msra.mxu0 %v2573_v9  ;;  %v2117_v9 = vld [vmem:[%s3731_s11 + $0x40] sm:$0xff] }
 0x338   : > { %2918 = vmatprep.subr.mxu0 %v2572_v10 }
 0x339   : > { %2919 = vmatpush3.msra.mxu0 %v2572_v10  ;;  %v2116_v10 = vld [vmem:[%s3731_s11 + $0x38] sm:$0xff] }
 0x33a   : > { %2920 = vmatprep.subr.mxu0 %v2571_v11 }
 0x33b   : > { %2921 = vmatpush3.msra.mxu0 %v2571_v11  ;;  %v2115_v11 = vld [vmem:[%s3731_s11 + $0x30] sm:$0xff] }
 0x33c   : > { %2922 = vmatprep.subr.mxu0 %v2570_v12 }
 0x33d   : > { %2923 = vmatpush3.msra.mxu0 %v2570_v12  ;;  %v2114_v12 = vld [vmem:[%s3731_s11 + $0x28] sm:$0xff] }
 0x33e   : > { %2924 = vmatprep.subr.mxu0 %v2569_v13 }
 0x33f   : > { %2925 = vmatpush3.msra.mxu0 %v2569_v13  ;;  %v2113_v13 = vld [vmem:[%s3731_s11 + $0x20] sm:$0xff] }
 0x340   : > { %2926 = vmatprep.subr.mxu0 %v2568_v14 }
 0x341   : > { %2927 = vmatpush3.msra.mxu0 %v2568_v14  ;;  %v2112_v14 = vld [vmem:[%s3731_s11 + $0x18] sm:$0xff] }
 0x342   : > { %2928 = vmatprep.subr.mxu0 %v2567_v15 }
 0x343   : > { %2929 = vmatpush3.msra.mxu0 %v2567_v15 }
 0x344   : > { %2930 = vmatprep.subr.mxu0 %v2566_v16 }
 0x345   : > { %2931 = vmatpush3.msra.mxu0 %v2566_v16 }
 0x346   : > { %2961 = vmatprep.subr.mxu0 %v3107_v21 }
 0x3ee   : > { %v2908_v22 = vpop.f32.mrf.mxu1 }
 0x3f0   : > { %v1298_v24 = vpop.f32.mrf.mxu1 }
 0x3f2   : > { %v2889_v17 = vpop.f32.mrf.mxu0 }
 0x3f3   : > { %v1304_v23 = vadd.f32 %v2908_v22, %v2889_v17 }
 0x3f4   : > { %v1217_v18 = vpop.f32.mrf.mxu0 }
 0x3f5   : > { %v1299_v27 = vadd.f32 %v1298_v24, %v1217_v18 }
 0x3f6   : > { %v2915_v19 = vpop.f32.mrf.mxu0 }
 0x3f8   : > { %v1373_v20 = vpop.f32.mrf.mxu0 }
 0x3f9   : > { %2932 = vmatprep.mubr.msk.f32.mxu0 %vm628_vm1, %v1373_v20  ;;  %v2613_v20 = vld [vmem:[%s3731_s11 + $0xf8] sm:$0xff] }
 0x3fa   : > { %2933 = vmatmul.mubr.msk.f32.vlgmr.msra.gmra.mxu0 %vm628_vm1, %v2915_v19 }
 0x3fb   : > { %2963 = vmatprep.mubr.msk.f32.mxu0 %vm3108_vm2, %v3107_v21 }
 0x4ba   : > { %v2934_v25 = vpop.f32.mrf.mxu0 }
 0x4bb   : > { %v1473_v28 = vadd.f32 %v2934_v25, %v1304_v23  ;;  %v2612_v23 = vld [vmem:[%s3731_s11 + $0xf0] sm:$0xff]  ;;  %v2611_v25 = vld [vmem:[%s3731_s11 + $0xe8] sm:$0xff] }
 0x4bc   : > { %v1463_v29 = vpop.f32.mrf.mxu0 }
 0x4bd   : > { %v3433_v30 = vadd.f32 %v2576_v26, %v1473_v28  ;;  %v1472_v31 = vadd.f32 %v1463_v29, %v1299_v27  ;;  %v2609_v27 = vld [vmem:[%s3731_s11 + $0xd8] sm:$0xff]  ;;  %v2608_v28 = vld [vmem:[%s3731_s11 + $0xd0] sm:$0xff]  ;;  %v2607_v29 = vld [vmem:[%s3731_s11 + $0xc8] sm:$0xff] }
 0x4bf   : > { %v3435_v32 = vadd.f32 %v2576_v26, %v1472_v31  ;;  %2936 = vmatpush3.msra.mxu1 %v3433_v30  ;;  %v2610_v26 = vld [vmem:[%s3731_s11 + $0xe0] sm:$0xff] }
 0x4c0   : > { %2937 = vmatprep.subr.mxu1 %v3107_v21  ;;  %v2606_v31 = vld [vmem:[%s3731_s11 + $0xc0] sm:$0xff] }
 0x4c1   : > { %2938 = vmatpush3.msra.mxu1 %v3435_v32 }
 0x4c2   : > { %2940 = vmatmul.mubr.msk.f32.vlgmr.msra.gmra.mxu1 %vm445_vm0, %v1483_v33  ;;  %2942 = vmatprep.subr.mxu1 %v3107_v21  ;;  %v2605_v33 = vld [vmem:[%s3731_s11 + $0xb8] sm:$0xff] }
 0x4c3   : > { %2943 = vmatpush3.msra.mxu1 %v1564_v34  ;;  %2958 = vmatprep.mubr.msk.f32.mxu1 %vm3108_vm2, %v3107_v21  ;;  %v2604_v34 = vld [vmem:[%s3731_s11 + $0xb0] sm:$0xff] }
 0x4c4   : > { %2944 = vmatprep.subr.mxu1 %v3107_v21 }
 0x4c5   : > { %2945 = vmatpush3.msra.mxu1 %v1563_v35  ;;  %v2603_v35 = vld [vmem:[%s3731_s11 + $0xa8] sm:$0xff] }
 0x4c6   : > { %2946 = vmatprep.subr.mxu1 %v3107_v21 }
 0x4c7   : > { %2947 = vmatpush3.msra.mxu1 %v1562_v36  ;;  %v2602_v36 = vld [vmem:[%s3731_s11 + $0xa0] sm:$0xff] }
 0x4c8   : > { %2948 = vmatprep.subr.mxu1 %v3107_v21 }
 0x4c9   : > { %2949 = vmatpush3.msra.mxu1 %v1561_v37  ;;  %v2601_v37 = vld [vmem:[%s3731_s11 + $0x98] sm:$0xff] }
 0x4ca   : > { %2950 = vmatprep.subr.mxu1 %v3107_v21 }
 0x4cb   : > { %2951 = vmatpush3.msra.mxu1 %v1560_v38  ;;  %v2111_v38 = vld [vmem:[%s3731_s11 + $0x10] sm:$0xff] }
 0x4cc   : > { %2952 = vmatprep.subr.mxu1 %v3107_v21 }
 0x4cd   : > { %2953 = vmatpush3.msra.mxu1 %v1559_v39  ;;  %v2600_v39 = vld [vmem:[%s3731_s11 + $0x90] sm:$0xff] }
 0x4ce   : > { %2954 = vmatprep.subr.mxu1 %v3107_v21 }
 0x4cf   : > { %2955 = vmatpush3.msra.mxu1 %v1558_v40  ;;  %v2110_v40 = vld [vmem:[%s3731_s11 + $0x8] sm:$0xff] }
 0x4d0   : > { %2956 = vmatprep.subr.mxu1 %v3107_v21 }
 0x4d1   : > { %2957 = vmatpush3.msra.mxu1 %v1557_v41  ;;  %v2599_v41 = vld [vmem:[%s3731_s11 + $0x88] sm:$0xff] }
 0x4d2   : > { %2971 = vmatprep.subr.mxu1 %v3107_v21 }
 0x582   : > { %v1553_v42 = vpop.f32.mrf.mxu1 }
 0x583   : > { %2959 = vmatmul.mubr.msk.f32.vlgmr.msra.gmra.mxu1 %vm628_vm1, %v1553_v42  ;;  %v2109_v42 = vld [vmem:[%s3731_s11] sm:$0xff] }
 0x584   : > { %v2941_v43 = vpop.f32.mrf.mxu1  ;;  %2979 = vmatprep.mubr.msk.f32.mxu1 %vm3108_vm2, %v3107_v21  ;;  %2972 = vmatpush3.msra.mxu1 %v2585_v44 }
 0x585   : > { %2973 = vmatprep.subr.mxu1 %v3107_v21  ;;  %v2598_v43 = vld [vmem:[%s3731_s11 + $0x80] sm:$0xff] }
 0x586   : > { %2974 = vmatpush3.msra.mxu1 %v2584_v45  ;;  %v2595_v45 = vld [vmem:[%s3730_s10] ss:$0 sm:$0xff] }
 0x587   : > { %2975 = vmatprep.subr.mxu1 %v3107_v21 }
 0x588   : > { %2976 = vmatpush3.msra.mxu1 %v2583_v55  ;;  %v2108_v55 = vld [vmem:[%s3732_s12 + $0x8] sm:$0xff] }
 0x589   : > { %2977 = vmatprep.subr.mxu1 %v3107_v21 }
 0x58a   : > { %2978 = vmatpush3.msra.mxu1 %v2582_v56 }
 0x58b   : > { %2993 = vmatprep.subr.mxu1 %v3107_v21 }
 0x643   : > { %v1634_v46 = vpop.f32.mrf.mxu1 }
 0x644   : > { %v1638_v47 = vmul.f32 0.25, %v1634_v46 }
 0x645   : > { %v2960_v49 = vpop.f32.mrf.mxu1 }
 0x646   : > { %2962 = vmatpush3.msra.mxu0 %v1638_v47  ;;  %v2596_v49 = vld [vmem:[%s3732_s12 + $0x10] sm:$0xff] }
 0x647   : > { %2964 = vmatmul.mubr.msk.f32.vlgmr.msra.gmra.mxu0 %vm1640_vm3, %v1639_v48  ;;  %2966 = vmatprep.subr.mxu0 %v3107_v21 }
 0x648   : > { %2967 = vmatpush3.msra.mxu0 %v1638_v47  ;;  %2968 = vmatprep.mubr.msk.f32.mxu0 %vm3108_vm2, %v3107_v21 }
 0x649   : > { %2982 = vmatprep.subr.mxu0 %v3107_v21 }
 0x64b   : > { %2969 = vmatmul.mubr.msk.f32.vlgmr.msra.gmra.mxu0 %vm1640_vm3, %v2580_v50 }
 0x64c   : > { %2983 = vmatpush3.msra.mxu0 %v1717_v51  ;;  %2990 = vmatprep.mubr.msk.f32.mxu0 %vm3108_vm2, %v3107_v21  ;;  %v2597_v51 = vld [vmem:[%s3732_s12 + $0x18] sm:$0xff] }
 0x64d   : > { %2984 = vmatprep.subr.mxu0 %v3107_v21 }
 0x64e   : > { %2985 = vmatpush3.msra.mxu0 %v1716_v52  ;;  %v2107_v52 = vld [vmem:[%s3732_s12] sm:$0xff] }
 0x64f   : > { %2986 = vmatprep.subr.mxu0 %v3107_v21 }
 0x650   : > { %2987 = vmatpush3.msra.mxu0 %v1715_v53 }
 0x651   : > { %2988 = vmatprep.subr.mxu0 %v3107_v21 }
 0x652   : > { %2989 = vmatpush3.msra.mxu0 %v1714_v54 }
 0x653   : > { %2998 = vmatprep.subr.mxu0 %v3107_v21 }
 0x707   : > { %v1710_v57 = vpop.f32.mrf.mxu0 }
 0x708   : > { %2991 = vmatmul.mubr.msk.f32.vlgmr.msra.gmra.mxu0 %vm1798_vm4, %v1710_v57 }
 0x709   : > { %v2965_v58 = vpop.f32.mrf.mxu0  ;;  %3006 = vmatprep.mubr.msk.f32.mxu0 %vm3108_vm2, %v3107_v21  ;;  %2999 = vmatpush3.msra.mxu0 %v2593_v62 }
 0x70a   : > { %3000 = vmatprep.subr.mxu0 %v3107_v21 }
 0x70b   : > { %v1789_v59 = vpop.f32.mrf.mxu0  ;;  %3001 = vmatpush3.msra.mxu0 %v2592_v63 }
 0x70c   : > { %2980 = vmatmul.mubr.msk.f32.vlgmr.msra.gmra.mxu1 %vm1798_vm4, %v1789_v59  ;;  %3002 = vmatprep.subr.mxu0 %v3107_v21 }
 0x70d   : > { %2994 = vmatpush3.msra.mxu1 %v1638_v47  ;;  %v2970_v60 = vpop.f32.mrf.mxu0  ;;  %2995 = vmatprep.mubr.msk.f32.mxu1 %vm3108_vm2, %v3107_v21 }
 0x70e   : > { %3009 = vmatprep.subr.mxu1 %v3107_v21  ;;  %3003 = vmatpush3.msra.mxu0 %v2591_v0 }
 0x70f   : > { %3004 = vmatprep.subr.mxu0 %v3107_v21 }
 0x710   : > { %2996 = vmatmul.mubr.msk.f32.vlgmr.msra.gmra.mxu1 %vm1640_vm3, %v2588_v61  ;;  %3005 = vmatpush3.msra.mxu0 %v2590_v1 }
 0x711   : > { %3041 = vmatprep.mubr.msk.f32.mxu1 %vm3108_vm2, %v3107_v21  ;;  %3044 = vmatprep.subr.mxu0 %v3107_v21 }
 0x712   : > { %3010 = vmatpush3.msra.mxu1 %v2124_v2 }
 0x713   : > { %3011 = vmatprep.subr.mxu1 %v3107_v21 }
 0x714   : > { %3012 = vmatpush3.msra.mxu1 %v2123_v3 }
 0x715   : > { %3013 = vmatprep.subr.mxu1 %v3107_v21 }
 0x716   : > { %3014 = vmatpush3.msra.mxu1 %v2122_v4 }
 0x717   : > { %3015 = vmatprep.subr.mxu1 %v3107_v21 }
 0x718   : > { %3016 = vmatpush3.msra.mxu1 %v2121_v5 }
 0x719   : > { %3017 = vmatprep.subr.mxu1 %v3107_v21 }
 0x71a   : > { %3018 = vmatpush3.msra.mxu1 %v2120_v6 }
 0x71b   : > { %3019 = vmatprep.subr.mxu1 %v3107_v21 }
 0x71c   : > { %3020 = vmatpush3.msra.mxu1 %v2119_v7 }
 0x71d   : > { %3021 = vmatprep.subr.mxu1 %v3107_v21 }
 0x71e   : > { %3022 = vmatpush3.msra.mxu1 %v2118_v8 }
 0x71f   : > { %3023 = vmatprep.subr.mxu1 %v3107_v21 }
 0x720   : > { %3024 = vmatpush3.msra.mxu1 %v2117_v9 }
 0x721   : > { %3025 = vmatprep.subr.mxu1 %v3107_v21 }
 0x722   : > { %3026 = vmatpush3.msra.mxu1 %v2116_v10 }
 0x723   : > { %3027 = vmatprep.subr.mxu1 %v3107_v21 }
 0x724   : > { %3028 = vmatpush3.msra.mxu1 %v2115_v11 }
 0x725   : > { %3029 = vmatprep.subr.mxu1 %v3107_v21 }
 0x726   : > { %3030 = vmatpush3.msra.mxu1 %v2114_v12 }
 0x727   : > { %3031 = vmatprep.subr.mxu1 %v3107_v21 }
 0x728   : > { %3032 = vmatpush3.msra.mxu1 %v2113_v13 }
 0x729   : > { %3033 = vmatprep.subr.mxu1 %v3107_v21 }
 0x72a   : > { %3034 = vmatpush3.msra.mxu1 %v2112_v14 }
 0x72b   : > { %3035 = vmatprep.subr.mxu1 %v3107_v21 }
 0x72c   : > { %3036 = vmatpush3.msra.mxu1 %v2111_v38 }
 0x72d   : > { %3037 = vmatprep.subr.mxu1 %v3107_v21 }
 0x72e   : > { %3038 = vmatpush3.msra.mxu1 %v2110_v40 }
 0x72f   : > { %3039 = vmatprep.subr.mxu1 %v3107_v21 }
 0x730   : > { %3040 = vmatpush3.msra.mxu1 %v2109_v42 }
 0x7c8   : > { %v1941_v15 = vpop.f32.mrf.mxu0 }
 0x7ca   : > { %v2992_v16 = vpop.f32.mrf.mxu0 }
 0x7cc   : > { %v1868_v17 = vpop.f32.mrf.mxu1 }
 0x7cd   : > { %v3609_v18 = vadd.f32 %v1941_v15, %v1868_v17 }
 0x7ce   : > { %v2981_v19 = vpop.f32.mrf.mxu1 }
 0x7d0   : > { %v2016_v22 = vpop.f32.mrf.mxu1 }
 0x7d1   : > { %3007 = vmatmul.mubr.msk.f32.vlgmr.msra.gmra.mxu0 %vm1798_vm4, %v2016_v22 }
 0x7d2   : > { %v2997_v24 = vpop.f32.mrf.mxu1  ;;  %3045 = vmatpush3.msra.mxu0 %v2613_v20  ;;  %3076 = vmatprep.mubr.msk.f32.mxu0 %vm3108_vm2, %v3107_v21 }
 0x7d3   : > { %3046 = vmatprep.subr.mxu0 %v3107_v21 }
 0x7d4   : > { %3047 = vmatpush3.msra.mxu0 %v2612_v23 }
 0x7d5   : > { %3048 = vmatprep.subr.mxu0 %v3107_v21 }
 0x7d6   : > { %3049 = vmatpush3.msra.mxu0 %v2611_v25 }
 0x7d7   : > { %3050 = vmatprep.subr.mxu0 %v3107_v21 }
 0x7d8   : > { %3051 = vmatpush3.msra.mxu0 %v2610_v26 }
 0x7d9   : > { %3052 = vmatprep.subr.mxu0 %v3107_v21 }
 0x7da   : > { %3053 = vmatpush3.msra.mxu0 %v2609_v27 }
 0x7db   : > { %3054 = vmatprep.subr.mxu0 %v3107_v21 }
 0x7dc   : > { %3055 = vmatpush3.msra.mxu0 %v2608_v28 }
 0x7dd   : > { %3056 = vmatprep.subr.mxu0 %v3107_v21 }
 0x7de   : > { %3057 = vmatpush3.msra.mxu0 %v2607_v29 }
 0x7df   : > { %3058 = vmatprep.subr.mxu0 %v3107_v21 }
 0x7e0   : > { %3059 = vmatpush3.msra.mxu0 %v2606_v31 }
 0x7e1   : > { %3060 = vmatprep.subr.mxu0 %v3107_v21 }
 0x7e2   : > { %3061 = vmatpush3.msra.mxu0 %v2605_v33 }
 0x7e3   : > { %3062 = vmatprep.subr.mxu0 %v3107_v21 }
 0x7e4   : > { %3063 = vmatpush3.msra.mxu0 %v2604_v34 }
 0x7e5   : > { %3064 = vmatprep.subr.mxu0 %v3107_v21 }
 0x7e6   : > { %3065 = vmatpush3.msra.mxu0 %v2603_v35 }
 0x7e7   : > { %3066 = vmatprep.subr.mxu0 %v3107_v21 }
 0x7e8   : > { %3067 = vmatpush3.msra.mxu0 %v2602_v36 }
 0x7e9   : > { %3068 = vmatprep.subr.mxu0 %v3107_v21 }
 0x7ea   : > { %3069 = vmatpush3.msra.mxu0 %v2601_v37 }
 0x7eb   : > { %3070 = vmatprep.subr.mxu0 %v3107_v21 }
 0x7ec   : > { %3071 = vmatpush3.msra.mxu0 %v2600_v39 }
 0x7ed   : > { %3072 = vmatprep.subr.mxu0 %v3107_v21 }
 0x7ee   : > { %3073 = vmatpush3.msra.mxu0 %v2599_v41 }
 0x7ef   : > { %3074 = vmatprep.subr.mxu0 %v3107_v21 }
 0x7f0   : > { %3075 = vmatpush3.msra.mxu0 %v2598_v43 }
 0x891   : > { %v2094_v44 = vpop.f32.mrf.mxu0 }
 0x892   : > { %v2098_v46 = vadd.f32 %v2094_v44, %v3609_v18 }
 0x893   : > { %v3008_v47 = vpop.f32.mrf.mxu0 }
 0x894   : > { %v2106_v48 = vadd.f32 %v2595_v45, %v2098_v46 }
 0x896   : > { %3042 = vmatmul.mubr.f32.vlgmr.msra.gmra.mxu1 %v2106_v48  ;;  %3077 = vmatmul.mubr.f32.vlgmr.msra.gmra.mxu0 %v2106_v48 }
 0x897   : > { %3081 = vmatprep.mubr.msk.f32.mxu1 %vm1640_vm3, %v2596_v49 }
 0x956   : > { %v2191_v21 = vpop.f32.mrf.mxu1  ;;  %v2281_v50 = vpop.f32.mrf.mxu0 }
 0x957   : > { %3079 = vmatprep.subr.mxu1 %v2281_v50 }
 0x958   : > { %v3043_v53 = vpop.f32.mrf.mxu1  ;;  %v3078_v54 = vpop.f32.mrf.mxu0  ;;  %3080 = vmatpush3.msra.mxu1 %v2281_v50 }
 0x959   : > { %3082 = vmatmul.mubr.msk.f32.vlgmr.msra.gmra.mxu1 %vm1640_vm3, %v2597_v51  ;;  %3084 = vmatprep.subr.mxu1 %v2191_v21 }
 0x95a   : > { %3085 = vmatpush3.msra.mxu1 %v2191_v21  ;;  %3086 = vmatprep.mubr.msk.f32.mxu1 %vm1640_vm3, %v2107_v52 }
 0x95d   : > { %3087 = vmatmul.mubr.msk.f32.vlgmr.msra.gmra.mxu1 %vm1640_vm3, %v2108_v55 }
 0xa19   : > { %v3083_v56 = vpop.f32.mrf.mxu1 }
 0xa1b   : > { %v2357_v57 = vpop.f32.mrf.mxu1 }
 0xa1d   : > { %v3088_v58 = vpop.f32.mrf.mxu1 }
 0xa1e   : > { %v2444_v59 = vadd.f32 %v3088_v58, %v3083_v56 }
 0xa1f   : > { %v2438_v60 = vpop.f32.mrf.mxu1 }
 0xa20   : > { %v2448_v61 = vsub.f32 %v3433_v30, %v2444_v59  ;;  %v2439_v62 = vadd.f32 %v2438_v60, %v2357_v57 }
 0xa22   : > { %2450 = vst.msk [vmem:[%s440_s28 + $0x8] sm:$0xff] %vm628_vm1, %v2448_v61  ;;  %v2447_v63 = vsub.f32 %v3435_v32, %v2439_v62 }
 0xa24   : > { %2449 = vst.msk [vmem:[%s440_s28] sm:$0xff] %vm628_vm1, %v2447_v63 }
 0xa25 PF: > { %s23_s25 = sadd.s32 1, %s3105_s25  }
 0xa26   : > { %p20_p4 = scmp.ge.s32.totalorder %s23_s25, 4  }
 0xa28   :  { %22 = sbr.rel (!%p20_p4) target bundleno = 1 (0x1), region = 114 }

</bundles_post_ra>
